<compile_context>
chip_gen: v7x
topology: tpu7x:2x2x1
jax: 0.10.0
libtpu: 0.0.40
codegen_flags: <defaults>
</compile_context>

<pallas_src>
from functools import partial

import jax
import jax.numpy as jnp
from jax.experimental import pallas as pl
from jax.experimental.pallas import tpu as pltpu


def _chamfer_knn_kernel(adv_rows_ref, adv_cols_ref, ori_cols_ref,
                        cham_ref, knn_ref, cham_sum, knn_scr, *, k, alpha):
    qi = pl.program_id(1)
    n_qblocks = pl.num_programs(1)

    adv_blk = adv_rows_ref[0].astype(jnp.float32)   # (TQ, 3) this block of adv points
    adv_all = adv_cols_ref[0].astype(jnp.float32)   # (3, N)  all adv points, lane-dense
    ori_all = ori_cols_ref[0].astype(jnp.float32)   # (3, M)  all ori points, lane-dense

    TQ = adv_blk.shape[0]
    N = adv_all.shape[1]
    M = ori_all.shape[1]

    row0 = qi * TQ
    if TQ % 8 == 0:
        row0 = pl.multiple_of(row0, 8)

    @pl.when(qi == 0)
    def _():
        cham_sum[...] = jnp.zeros_like(cham_sum)

    # Per-row squared norms ||adv_q||^2 -- kept out of the big slabs (constant
    # per row, so it can be added to the per-row min / k-mean afterwards).
    rx = jnp.sum(adv_blk * adv_blk, axis=1, keepdims=True)               # (TQ, 1)

    # ----- Chamfer (method='adv2ori'): min_m ||adv_q - ori_m||^2 ------------
    ry_ori = jnp.sum(ori_all * ori_all, axis=0, keepdims=True)           # (1, M)
    zz_o = jnp.dot(adv_blk, ori_all,
                   preferred_element_type=jnp.float32)                   # (TQ, M) MXU
    t_cham = ry_ori - 2.0 * zz_o                                         # (TQ, M)
    cham_min = rx + jnp.min(t_cham, axis=1, keepdims=True)               # (TQ, 1)
    cham_sum[...] = cham_sum[...] + jnp.sum(cham_min, axis=0, keepdims=True)

    # ----- kNN statistic over adv points -------------------------------------
    ry_adv = jnp.sum(adv_all * adv_all, axis=0, keepdims=True)           # (1, N)
    zz_s = jnp.dot(adv_blk, adv_all,
                   preferred_element_type=jnp.float32)                   # (TQ, N) MXU
    t_self = ry_adv - 2.0 * zz_s                                         # (TQ, N) = D - rx

    # torch: topk of the k+1 smallest (including self), then drop the smallest.
    # Store-free selection: each step takes the minimum strictly above the
    # previous one; the slab itself is never rewritten.
    prev = jnp.full((TQ, 1), -jnp.inf, jnp.float32)
    acc = jnp.zeros((TQ, 1), jnp.float32)
    for step in range(k + 1):
        cand = jnp.where(t_self > prev, t_self, jnp.inf)
        cur = jnp.min(cand, axis=1, keepdims=True)
        if step > 0:  # step 0 is the dropped (self) minimum
            acc = acc + jnp.where(cur < jnp.inf, cur, 0.0)
        prev = cur
    knn_scr[pl.ds(row0, TQ), :] = acc * (1.0 / float(k)) + rx            # mean kNN dist

    # ----- finalize per-batch scalars after the last row block ---------------
    @pl.when(qi == n_qblocks - 1)
    def _():
        n_f = float(N)
        chamfer_b = cham_sum[...] * (1.0 / n_f)                          # (1, 1)

        vals = knn_scr[...]                                              # (N, 1)
        mean_v = jnp.sum(vals, axis=0, keepdims=True) * (1.0 / n_f)
        diff = vals - mean_v
        var_v = jnp.sum(diff * diff, axis=0, keepdims=True) * (1.0 / (n_f - 1.0))
        threshold = mean_v + alpha * jnp.sqrt(var_v)                     # torch.std ddof=1
        mask = jnp.where(vals > threshold, 1.0, 0.0)
        knn_b = jnp.sum(vals * mask, axis=0, keepdims=True) * (1.0 / n_f)

        cham_ref[...] = jnp.broadcast_to(chamfer_b, cham_ref.shape)
        knn_ref[...] = jnp.broadcast_to(knn_b, knn_ref.shape)


def _pick_row_block(n, m, vmem_limit_bytes):
    """Largest adv row-block whose live slabs fit comfortably in VMEM."""
    for tq in (256, 128):
        if n % tq == 0 and n >= tq:
            # ~2 f32 slabs of width N + one of width M, plus the padded kNN
            # scratch and the double-buffered column inputs.
            est = (2 * n + m) * tq * 4 + n * 512 + 2 * 8 * (n + m) * 4
            if est <= (2 * vmem_limit_bytes) // 3:
                return tq
    # TODO(synk): pad N up to a multiple of 128 (with masking) for ragged point
    # counts / very large N instead of this single-row-block fallback, and add
    # a column-chunked inner loop for N >~ 8k on v7x.
    return n


def chamfer_knn_dist(adv_pc, ori_pc, weights=None, batch_avg=True,
                     chamfer_weight=5.0, knn_weight=3.0, k=5, alpha=1.05):
    """JAX/Pallas equivalent of ChamferkNNDist.forward (chamfer_method='adv2ori')."""
    B, N, C = adv_pc.shape
    _, M, C2 = ori_pc.shape
    assert C == 3 and C2 == 3, "point clouds must be (B, P, 3)"
    assert N > k, "need more adv points than knn_k"

    # Lane-dense column layouts for the RHS of the MXU distance builds.
    adv_t = jnp.transpose(adv_pc, (0, 2, 1))   # (B, 3, N)
    ori_t = jnp.transpose(ori_pc, (0, 2, 1))   # (B, 3, M)

    # Generation-aware VMEM budget (v7x: 64 MiB/TC, v5e/v6e: 128 MiB).
    vmem_cap = 64 * 1024 * 1024
    try:
        vmem_cap = int(pltpu.get_tpu_info().vmem_capacity_bytes)
    except Exception:
        pass
    vmem_limit = int(min((vmem_cap * 5) // 8, 100 * 1024 * 1024))

    TQ = _pick_row_block(N, M, vmem_limit)
    QB = N // TQ

    kern = partial(_chamfer_knn_kernel, k=k, alpha=alpha)
    cham_t, knn_t = pl.pallas_call(
        kern,
        out_shape=(jax.ShapeDtypeStruct((B, 1, 128), jnp.float32),
                   jax.ShapeDtypeStruct((B, 1, 128), jnp.float32)),
        grid_spec=pltpu.PrefetchScalarGridSpec(
            num_scalar_prefetch=0,
            grid=(B, QB),
            in_specs=[pl.BlockSpec((1, TQ, 3), lambda b, q: (b, q, 0)),   # adv row block
                      pl.BlockSpec((1, 3, N), lambda b, q: (b, 0, 0)),    # adv columns
                      pl.BlockSpec((1, 3, M), lambda b, q: (b, 0, 0))],   # ori columns
            out_specs=[pl.BlockSpec((1, 1, 128), lambda b, q: (b, 0, 0)),
                       pl.BlockSpec((1, 1, 128), lambda b, q: (b, 0, 0))],
            scratch_shapes=[pltpu.VMEM((1, 1), jnp.float32),    # running chamfer sum
                            pltpu.VMEM((N, 1), jnp.float32)]),  # per-point kNN values
        compiler_params=pltpu.CompilerParams(
            dimension_semantics=("parallel", "arbitrary"),
            vmem_limit_bytes=vmem_limit),
    )(adv_pc, adv_t, ori_t)
    # TODO(synk): for B < 2 on v7x, shard the q axis across the two TensorCores
    # (CORE_PARALLEL + per-core partial sums) instead of batch-only parallelism.

    loss1 = cham_t[:, 0, 0]   # per-batch chamfer (adv2ori)
    knn = knn_t[:, 0, 0]      # per-batch masked kNN loss

    if weights is None:
        weights = jnp.ones((B,), jnp.float32)
    weights = weights.astype(jnp.float32)

    chamfer_loss = loss1 * weights
    knn_loss = knn * weights
    if batch_avg:
        chamfer_loss = jnp.mean(chamfer_loss)
        knn_loss = jnp.mean(knn_loss)
    return chamfer_loss * chamfer_weight + knn_loss * knn_weight


def _reference_loss(adv_pc, ori_pc, k, alpha, chamfer_weight, knn_weight):
    """Pure-JAX transcription of the PyTorch forward (for a sanity check)."""
    adv = adv_pc.astype(jnp.float32)
    ori = ori_pc.astype(jnp.float32)
    d = jnp.sum((adv[:, :, None, :] - ori[:, None, :, :]) ** 2, axis=-1)   # (B, N, M)
    loss1 = jnp.mean(jnp.min(d, axis=2), axis=1)                           # adv2ori
    s = jnp.sum((adv[:, :, None, :] - adv[:, None, :, :]) ** 2, axis=-1)   # (B, N, N)
    neg_top, _ = jax.lax.top_k(-s, k + 1)
    value = jnp.mean(-neg_top[..., 1:], axis=-1)                           # (B, N)
    mean = jnp.mean(value, axis=-1, keepdims=True)
    std = jnp.std(value, axis=-1, ddof=1, keepdims=True)
    mask = (value > mean + alpha * std).astype(jnp.float32)
    loss_knn = jnp.mean(value * mask, axis=1)
    return jnp.mean(loss1) * chamfer_weight + jnp.mean(loss_knn) * knn_weight


if __name__ == "__main__":
    # ChamferkNNDist has no learnable parameters; only hyper-params
    # (chamfer_weight=5.0, knn_weight=3.0, knn_k=5, knn_alpha=1.05).
    key = jax.random.PRNGKey(0)
    k_adv, k_ori = jax.random.split(key)
    B, N, M = 2, 64, 64
    adv_pc = jax.random.normal(k_adv, (B, N, 3), dtype=jnp.float32)
    ori_pc = jax.random.normal(k_ori, (B, M, 3), dtype=jnp.float32)

    loss = chamfer_knn_dist(adv_pc, ori_pc,
                            chamfer_weight=5.0, knn_weight=3.0,
                            k=5, alpha=1.05)
    loss = jax.block_until_ready(loss)

    ref = _reference_loss(adv_pc, ori_pc, k=5, alpha=1.05,
                          chamfer_weight=5.0, knn_weight=3.0)
    assert bool(jnp.isfinite(loss)), float(loss)
    assert abs(float(loss) - float(ref)) <= 1e-3 * max(1.0, abs(float(ref))), \
        (float(loss), float(ref))
    print("KERNEL_OK")
</pallas_src>

<mosaic_0001>
module attributes {stable_mosaic.version = 11 : i64} {
  func.func @_chamfer_knn_kernel(%arg0: i32, %arg1: i32, %arg2: memref<1x64x3xf32, #tpu.memory_space<vmem>>, %arg3: memref<1x3x64xf32, #tpu.memory_space<vmem>>, %arg4: memref<1x3x64xf32, #tpu.memory_space<vmem>>, %arg5: memref<1x1x128xf32, #tpu.memory_space<vmem>>, %arg6: memref<1x1x128xf32, #tpu.memory_space<vmem>>, %arg7: memref<1x1xf32, #tpu.memory_space<vmem>>, %arg8: memref<64x1xf32, #tpu.memory_space<vmem>>) attributes {dimension_semantics = [#tpu.dimension_semantics<parallel>, #tpu.dimension_semantics<arbitrary>], iteration_bounds = array<i64: 2, 1>, scalar_prefetch = 0 : i64, scratch_operands = 2 : i64, tpu.core_type = #tpu.core_type<tc>, window_params = [{transform_indices = @transform_0, window_bounds = array<i64: 1, 64, 3>}, {transform_indices = @transform_1, window_bounds = array<i64: 1, 3, 64>}, {transform_indices = @transform_2, window_bounds = array<i64: 1, 3, 64>}, {transform_indices = @transform_3, window_bounds = array<i64: 1, 1, 128>}, {transform_indices = @transform_4, window_bounds = array<i64: 1, 1, 128>}]} {
    %c0 = arith.constant 0 : index
    %c0_0 = arith.constant 0 : index
    %c0_1 = arith.constant 0 : index
    %0 = vector.load %arg2[%c0, %c0_0, %c0_1] : memref<1x64x3xf32, #tpu.memory_space<vmem>>, vector<1x64x3xf32>
    %1 = vector.shape_cast %0 : vector<1x64x3xf32> to vector<64x3xf32>
    %c0_2 = arith.constant 0 : index
    %c0_3 = arith.constant 0 : index
    %c0_4 = arith.constant 0 : index
    %2 = vector.load %arg3[%c0_2, %c0_3, %c0_4] : memref<1x3x64xf32, #tpu.memory_space<vmem>>, vector<1x3x64xf32>
    %3 = vector.shape_cast %2 : vector<1x3x64xf32> to vector<3x64xf32>
    %c0_5 = arith.constant 0 : index
    %c0_6 = arith.constant 0 : index
    %c0_7 = arith.constant 0 : index
    %4 = vector.load %arg4[%c0_5, %c0_6, %c0_7] : memref<1x3x64xf32, #tpu.memory_space<vmem>>, vector<1x3x64xf32>
    %5 = vector.shape_cast %4 : vector<1x3x64xf32> to vector<3x64xf32>
    %c64_i32 = arith.constant 64 : i32
    %6 = arith.muli %arg1, %c64_i32 : i32
    %7 = tpu.assume_multiple %6, 8 : i32
    %c0_i32 = arith.constant 0 : i32
    %8 = arith.cmpi eq, %arg1, %c0_i32 : i32
    %9 = arith.extui %8 : i1 to i32
    %c0_i32_8 = arith.constant 0 : i32
    %10 = arith.cmpi ne, %9, %c0_i32_8 : i32
    scf.if %10 {
      %cst_49 = arith.constant 0.000000e+00 : f32
      %109 = vector.broadcast %cst_49 : f32 to vector<1x1xf32>
      %c0_50 = arith.constant 0 : index
      %c0_51 = arith.constant 0 : index
      %110 = vector.load %arg7[%c0_50, %c0_51] : memref<1x1xf32, #tpu.memory_space<vmem>>, vector<1x1xf32>
      tpu.vector_store %arg7[%c0_50, %c0_51], %109 {strides = array<i32>} : memref<1x1xf32, #tpu.memory_space<vmem>>, vector<1x1xf32>,
    } else {
    }
    %11 = arith.mulf %1, %1 : vector<64x3xf32>
    %cst = arith.constant dense<0.000000e+00> : vector<64xf32>
    %12 = vector.multi_reduction <add>, %11, %cst [1] : vector<64x3xf32> to vector<64xf32>
    %13 = vector.shape_cast %12 : vector<64xf32> to vector<64x1xf32>
    %14 = arith.mulf %5, %5 : vector<3x64xf32>
    %cst_9 = arith.constant dense<0.000000e+00> : vector<64xf32>
    %15 = vector.multi_reduction <add>, %14, %cst_9 [0] : vector<3x64xf32> to vector<64xf32>
    %16 = vector.shape_cast %15 : vector<64xf32> to vector<1x64xf32>
    %cst_10 = arith.constant dense<0.000000e+00> : vector<64x64xf32>
    %17 = tpu.matmul %1, %5, %cst_10 {dimension_numbers = #tpu.dot_dimension_numbers<[1], [0], [0], [1], [0, 0, 1, 1], [], []>} : vector<64x3xf32>, vector<3x64xf32>, vector<64x64xf32> -> vector<64x64xf32>
    %cst_11 = arith.constant 2.000000e+00 : f32
    %18 = vector.broadcast %cst_11 : f32 to vector<64x64xf32>
    %19 = arith.mulf %18, %17 : vector<64x64xf32>
    %20 = vector.broadcast %16 : vector<1x64xf32> to vector<64x64xf32>
    %21 = arith.subf %20, %19 : vector<64x64xf32>
    %cst_12 = arith.constant dense<0x7F800000> : vector<64xf32>
    %22 = vector.multi_reduction <minimumf>, %21, %cst_12 [1] : vector<64x64xf32> to vector<64xf32>
    %23 = vector.shape_cast %22 : vector<64xf32> to vector<64x1xf32>
    %24 = arith.addf %13, %23 : vector<64x1xf32>
    %c0_13 = arith.constant 0 : index
    %c0_14 = arith.constant 0 : index
    %25 = vector.load %arg7[%c0_13, %c0_14] : memref<1x1xf32, #tpu.memory_space<vmem>>, vector<1x1xf32>
    %cst_15 = arith.constant dense<0.000000e+00> : vector<1xf32>
    %26 = vector.multi_reduction <add>, %24, %cst_15 [0] : vector<64x1xf32> to vector<1xf32>
    %27 = vector.shape_cast %26 : vector<1xf32> to vector<1x1xf32>
    %28 = arith.addf %25, %27 : vector<1x1xf32>
    %c0_16 = arith.constant 0 : index
    %c0_17 = arith.constant 0 : index
    %29 = vector.load %arg7[%c0_16, %c0_17] : memref<1x1xf32, #tpu.memory_space<vmem>>, vector<1x1xf32>
    tpu.vector_store %arg7[%c0_16, %c0_17], %28 {strides = array<i32>} : memref<1x1xf32, #tpu.memory_space<vmem>>, vector<1x1xf32>,
    %30 = arith.mulf %3, %3 : vector<3x64xf32>
    %cst_18 = arith.constant dense<0.000000e+00> : vector<64xf32>
    %31 = vector.multi_reduction <add>, %30, %cst_18 [0] : vector<3x64xf32> to vector<64xf32>
    %32 = vector.shape_cast %31 : vector<64xf32> to vector<1x64xf32>
    %cst_19 = arith.constant dense<0.000000e+00> : vector<64x64xf32>
    %33 = tpu.matmul %1, %3, %cst_19 {dimension_numbers = #tpu.dot_dimension_numbers<[1], [0], [0], [1], [0, 0, 1, 1], [], []>} : vector<64x3xf32>, vector<3x64xf32>, vector<64x64xf32> -> vector<64x64xf32>
    %cst_20 = arith.constant 2.000000e+00 : f32
    %34 = vector.broadcast %cst_20 : f32 to vector<64x64xf32>
    %35 = arith.mulf %34, %33 : vector<64x64xf32>
    %36 = vector.broadcast %32 : vector<1x64xf32> to vector<64x64xf32>
    %37 = arith.subf %36, %35 : vector<64x64xf32>
    %cst_21 = arith.constant 0xFF800000 : f32
    %38 = vector.broadcast %cst_21 : f32 to vector<64x1xf32>
    %cst_22 = arith.constant 0.000000e+00 : f32
    %39 = vector.broadcast %cst_22 : f32 to vector<64x1xf32>
    %40 = vector.broadcast %38 : vector<64x1xf32> to vector<64x64xf32>
    %41 = arith.cmpf ogt, %37, %40 : vector<64x64xf32>
    %cst_23 = arith.constant 0x7F800000 : f32
    %42 = vector.broadcast %cst_23 : f32 to vector<64x64xf32>
    %43 = arith.select %41, %37, %42 : vector<64x64xi1>, vector<64x64xf32>
    %cst_24 = arith.constant dense<0x7F800000> : vector<64xf32>
    %44 = vector.multi_reduction <minimumf>, %43, %cst_24 [1] : vector<64x64xf32> to vector<64xf32>
    %45 = vector.shape_cast %44 : vector<64xf32> to vector<64x1xf32>
    %46 = vector.broadcast %45 : vector<64x1xf32> to vector<64x64xf32>
    %47 = arith.cmpf ogt, %37, %46 : vector<64x64xf32>
    %cst_25 = arith.constant 0x7F800000 : f32
    %48 = vector.broadcast %cst_25 : f32 to vector<64x64xf32>
    %49 = arith.select %47, %37, %48 : vector<64x64xi1>, vector<64x64xf32>
    %cst_26 = arith.constant dense<0x7F800000> : vector<64xf32>
    %50 = vector.multi_reduction <minimumf>, %49, %cst_26 [1] : vector<64x64xf32> to vector<64xf32>
    %51 = vector.shape_cast %50 : vector<64xf32> to vector<64x1xf32>
    %cst_27 = arith.constant 0x7F800000 : f32
    %52 = vector.broadcast %cst_27 : f32 to vector<64x1xf32>
    %53 = arith.cmpf olt, %51, %52 : vector<64x1xf32>
    %cst_28 = arith.constant 0.000000e+00 : f32
    %54 = vector.broadcast %cst_28 : f32 to vector<64x1xf32>
    %55 = arith.select %53, %51, %54 : vector<64x1xi1>, vector<64x1xf32>
    %56 = arith.addf %39, %55 : vector<64x1xf32>
    %57 = vector.broadcast %51 : vector<64x1xf32> to vector<64x64xf32>
    %58 = arith.cmpf ogt, %37, %57 : vector<64x64xf32>
    %cst_29 = arith.constant 0x7F800000 : f32
    %59 = vector.broadcast %cst_29 : f32 to vector<64x64xf32>
    %60 = arith.select %58, %37, %59 : vector<64x64xi1>, vector<64x64xf32>
    %cst_30 = arith.constant dense<0x7F800000> : vector<64xf32>
    %61 = vector.multi_reduction <minimumf>, %60, %cst_30 [1] : vector<64x64xf32> to vector<64xf32>
    %62 = vector.shape_cast %61 : vector<64xf32> to vector<64x1xf32>
    %cst_31 = arith.constant 0x7F800000 : f32
    %63 = vector.broadcast %cst_31 : f32 to vector<64x1xf32>
    %64 = arith.cmpf olt, %62, %63 : vector<64x1xf32>
    %cst_32 = arith.constant 0.000000e+00 : f32
    %65 = vector.broadcast %cst_32 : f32 to vector<64x1xf32>
    %66 = arith.select %64, %62, %65 : vector<64x1xi1>, vector<64x1xf32>
    %67 = arith.addf %56, %66 : vector<64x1xf32>
    %68 = vector.broadcast %62 : vector<64x1xf32> to vector<64x64xf32>
    %69 = arith.cmpf ogt, %37, %68 : vector<64x64xf32>
    %cst_33 = arith.constant 0x7F800000 : f32
    %70 = vector.broadcast %cst_33 : f32 to vector<64x64xf32>
    %71 = arith.select %69, %37, %70 : vector<64x64xi1>, vector<64x64xf32>
    %cst_34 = arith.constant dense<0x7F800000> : vector<64xf32>
    %72 = vector.multi_reduction <minimumf>, %71, %cst_34 [1] : vector<64x64xf32> to vector<64xf32>
    %73 = vector.shape_cast %72 : vector<64xf32> to vector<64x1xf32>
    %cst_35 = arith.constant 0x7F800000 : f32
    %74 = vector.broadcast %cst_35 : f32 to vector<64x1xf32>
    %75 = arith.cmpf olt, %73, %74 : vector<64x1xf32>
    %cst_36 = arith.constant 0.000000e+00 : f32
    %76 = vector.broadcast %cst_36 : f32 to vector<64x1xf32>
    %77 = arith.select %75, %73, %76 : vector<64x1xi1>, vector<64x1xf32>
    %78 = arith.addf %67, %77 : vector<64x1xf32>
    %79 = vector.broadcast %73 : vector<64x1xf32> to vector<64x64xf32>
    %80 = arith.cmpf ogt, %37, %79 : vector<64x64xf32>
    %cst_37 = arith.constant 0x7F800000 : f32
    %81 = vector.broadcast %cst_37 : f32 to vector<64x64xf32>
    %82 = arith.select %80, %37, %81 : vector<64x64xi1>, vector<64x64xf32>
    %cst_38 = arith.constant dense<0x7F800000> : vector<64xf32>
    %83 = vector.multi_reduction <minimumf>, %82, %cst_38 [1] : vector<64x64xf32> to vector<64xf32>
    %84 = vector.shape_cast %83 : vector<64xf32> to vector<64x1xf32>
    %cst_39 = arith.constant 0x7F800000 : f32
    %85 = vector.broadcast %cst_39 : f32 to vector<64x1xf32>
    %86 = arith.cmpf olt, %84, %85 : vector<64x1xf32>
    %cst_40 = arith.constant 0.000000e+00 : f32
    %87 = vector.broadcast %cst_40 : f32 to vector<64x1xf32>
    %88 = arith.select %86, %84, %87 : vector<64x1xi1>, vector<64x1xf32>
    %89 = arith.addf %78, %88 : vector<64x1xf32>
    %90 = vector.broadcast %84 : vector<64x1xf32> to vector<64x64xf32>
    %91 = arith.cmpf ogt, %37, %90 : vector<64x64xf32>
    %cst_41 = arith.constant 0x7F800000 : f32
    %92 = vector.broadcast %cst_41 : f32 to vector<64x64xf32>
    %93 = arith.select %91, %37, %92 : vector<64x64xi1>, vector<64x64xf32>
    %cst_42 = arith.constant dense<0x7F800000> : vector<64xf32>
    %94 = vector.multi_reduction <minimumf>, %93, %cst_42 [1] : vector<64x64xf32> to vector<64xf32>
    %95 = vector.shape_cast %94 : vector<64xf32> to vector<64x1xf32>
    %cst_43 = arith.constant 0x7F800000 : f32
    %96 = vector.broadcast %cst_43 : f32 to vector<64x1xf32>
    %97 = arith.cmpf olt, %95, %96 : vector<64x1xf32>
    %cst_44 = arith.constant 0.000000e+00 : f32
    %98 = vector.broadcast %cst_44 : f32 to vector<64x1xf32>
    %99 = arith.select %97, %95, %98 : vector<64x1xi1>, vector<64x1xf32>
    %100 = arith.addf %89, %99 : vector<64x1xf32>
    %cst_45 = arith.constant 2.000000e-01 : f32
    %101 = vector.broadcast %cst_45 : f32 to vector<64x1xf32>
    %102 = arith.mulf %100, %101 : vector<64x1xf32>
    %103 = arith.addf %102, %13 : vector<64x1xf32>
    %104 = arith.index_cast %7 : i32 to index
    %c0_46 = arith.constant 0 : index
    %105 = vector.load %arg8[%104, %c0_46] : memref<64x1xf32, #tpu.memory_space<vmem>>, vector<64x1xf32>
    tpu.vector_store %arg8[%104, %c0_46], %103 {strides = array<i32>} : memref<64x1xf32, #tpu.memory_space<vmem>>, vector<64x1xf32>,
    %c0_i32_47 = arith.constant 0 : i32
    %106 = arith.cmpi eq, %arg1, %c0_i32_47 : i32
    %107 = arith.extui %106 : i1 to i32
    %c0_i32_48 = arith.constant 0 : i32
    %108 = arith.cmpi ne, %107, %c0_i32_48 : i32
    scf.if %108 {
      %c0_49 = arith.constant 0 : index
      %c0_50 = arith.constant 0 : index
      %109 = vector.load %arg7[%c0_49, %c0_50] : memref<1x1xf32, #tpu.memory_space<vmem>>, vector<1x1xf32>
      %cst_51 = arith.constant 1.562500e-02 : f32
      %110 = vector.broadcast %cst_51 : f32 to vector<1x1xf32>
      %111 = arith.mulf %109, %110 : vector<1x1xf32>
      %c0_52 = arith.constant 0 : index
      %c0_53 = arith.constant 0 : index
      %112 = vector.load %arg8[%c0_52, %c0_53] : memref<64x1xf32, #tpu.memory_space<vmem>>, vector<64x1xf32>
      %cst_54 = arith.constant dense<0.000000e+00> : vector<1xf32>
      %113 = vector.multi_reduction <add>, %112, %cst_54 [0] : vector<64x1xf32> to vector<1xf32>
      %114 = vector.shape_cast %113 : vector<1xf32> to vector<1x1xf32>
      %cst_55 = arith.constant 1.562500e-02 : f32
      %115 = vector.broadcast %cst_55 : f32 to vector<1x1xf32>
      %116 = arith.mulf %114, %115 : vector<1x1xf32>
      %117 = vector.broadcast %116 : vector<1x1xf32> to vector<64x1xf32>
      %118 = arith.subf %112, %117 : vector<64x1xf32>
      %119 = arith.mulf %118, %118 : vector<64x1xf32>
      %cst_56 = arith.constant dense<0.000000e+00> : vector<1xf32>
      %120 = vector.multi_reduction <add>, %119, %cst_56 [0] : vector<64x1xf32> to vector<1xf32>
      %121 = vector.shape_cast %120 : vector<1xf32> to vector<1x1xf32>
      %cst_57 = arith.constant 0.0158730168 : f32
      %122 = vector.broadcast %cst_57 : f32 to vector<1x1xf32>
      %123 = arith.mulf %121, %122 : vector<1x1xf32>
      %124 = math.sqrt %123 : vector<1x1xf32>
      %cst_58 = arith.constant 1.050000e+00 : f32
      %125 = vector.broadcast %cst_58 : f32 to vector<1x1xf32>
      %126 = arith.mulf %125, %124 : vector<1x1xf32>
      %127 = arith.addf %116, %126 : vector<1x1xf32>
      %128 = vector.broadcast %127 : vector<1x1xf32> to vector<64x1xf32>
      %129 = arith.cmpf ogt, %112, %128 : vector<64x1xf32>
      %cst_59 = arith.constant 1.000000e+00 : f32
      %cst_60 = arith.constant 0.000000e+00 : f32
      %130 = vector.broadcast %cst_59 : f32 to vector<64x1xf32>
      %131 = vector.broadcast %cst_60 : f32 to vector<64x1xf32>
      %132 = arith.select %129, %130, %131 : vector<64x1xi1>, vector<64x1xf32>
      %133 = arith.mulf %112, %132 : vector<64x1xf32>
      %cst_61 = arith.constant dense<0.000000e+00> : vector<1xf32>
      %134 = vector.multi_reduction <add>, %133, %cst_61 [0] : vector<64x1xf32> to vector<1xf32>
      %135 = vector.shape_cast %134 : vector<1xf32> to vector<1x1xf32>
      %cst_62 = arith.constant 1.562500e-02 : f32
      %136 = vector.broadcast %cst_62 : f32 to vector<1x1xf32>
      %137 = arith.mulf %135, %136 : vector<1x1xf32>
      %138 = vector.shape_cast %111 : vector<1x1xf32> to vector<1x1x1xf32>
      %139 = vector.broadcast %138 : vector<1x1x1xf32> to vector<1x1x128xf32>
      %c0_63 = arith.constant 0 : index
      %c0_64 = arith.constant 0 : index
      %c0_65 = arith.constant 0 : index
      %140 = vector.load %arg5[%c0_63, %c0_64, %c0_65] : memref<1x1x128xf32, #tpu.memory_space<vmem>>, vector<1x1x128xf32>
      tpu.vector_store %arg5[%c0_63, %c0_64, %c0_65], %139 {strides = array<i32>} : memref<1x1x128xf32, #tpu.memory_space<vmem>>, vector<1x1x128xf32>,
      %141 = vector.shape_cast %137 : vector<1x1xf32> to vector<1x1x1xf32>
      %142 = vector.broadcast %141 : vector<1x1x1xf32> to vector<1x1x128xf32>
      %c0_66 = arith.constant 0 : index
      %c0_67 = arith.constant 0 : index
      %c0_68 = arith.constant 0 : index
      %143 = vector.load %arg6[%c0_66, %c0_67, %c0_68] : memref<1x1x128xf32, #tpu.memory_space<vmem>>, vector<1x1x128xf32>
      tpu.vector_store %arg6[%c0_66, %c0_67, %c0_68], %142 {strides = array<i32>} : memref<1x1x128xf32, #tpu.memory_space<vmem>>, vector<1x1x128xf32>,
    } else {
    }
    return
  }
  func.func @transform_0(%arg0: i32, %arg1: i32) -> (i32, i32, i32) {
    %c0_i32 = arith.constant 0 : i32
    %c0_i32_0 = arith.constant 0 : i32
    return %arg0, %arg1, %c0_i32 : i32, i32, i32
  }
  func.func @transform_1(%arg0: i32, %arg1: i32) -> (i32, i32, i32) {
    %c0_i32 = arith.constant 0 : i32
    %c0_i32_0 = arith.constant 0 : i32
    %c0_i32_1 = arith.constant 0 : i32
    return %arg0, %c0_i32, %c0_i32_0 : i32, i32, i32
  }
  func.func @transform_2(%arg0: i32, %arg1: i32) -> (i32, i32, i32) {
    %c0_i32 = arith.constant 0 : i32
    %c0_i32_0 = arith.constant 0 : i32
    %c0_i32_1 = arith.constant 0 : i32
    return %arg0, %c0_i32, %c0_i32_0 : i32, i32, i32
  }
  func.func @transform_3(%arg0: i32, %arg1: i32) -> (i32, i32, i32) {
    %c0_i32 = arith.constant 0 : i32
    %c0_i32_0 = arith.constant 0 : i32
    %c0_i32_1 = arith.constant 0 : i32
    return %arg0, %c0_i32, %c0_i32_0 : i32, i32, i32
  }
  func.func @transform_4(%arg0: i32, %arg1: i32) -> (i32, i32, i32) {
    %c0_i32 = arith.constant 0 : i32
    %c0_i32_0 = arith.constant 0 : i32
    %c0_i32_1 = arith.constant 0 : i32
    return %arg0, %c0_i32, %c0_i32_0 : i32, i32, i32
  }
}

</mosaic_0001>

<bundles_post_ra>
// kernel: tpu_custom_call.1
= control target key start
LH: loop header
LB: loop body
LE: loop exit
PB: predicated region body
PF: predicated region fallthrough
CT: control target
= control target key end

     0   :  { %10 = vsyncpa [#allocation5], 0  ;;  %s2310_s0 = inlined_call_operand.vmem [shape: f32[2,64,3], index: 0, kind: input, shape index: {}]   ;;  %s2311_s1 = inlined_call_operand.vmem [shape: f32[2,3,64], index: 1, kind: input, shape index: {}]   ;;  %s2312_s2 = inlined_call_operand.vmem [shape: f32[2,3,64], index: 2, kind: input, shape index: {}]   ;;  %s2313_s3 = inlined_call_operand.hbm [shape: f32[2,1,128], index: 3, kind: output, shape index: {0}]   ;;  %s2314_s4 = inlined_call_operand.hbm [shape: f32[2,1,128], index: 4, kind: output, shape index: {1}]  }
   0x1   :  { %12 = vsyncpa [#allocation5 + $0x1], 0 }
   0x2   :  { %13 = vsyncpa [#allocation7], 0 }
   0x3   :  { %15 = vsyncpa [#allocation7 + $0x1], 0  ;;  %s1625_s15 = smov 0   ;;  %s1627_s16 = smov 0  }
   0x4   :  { %s1629_s17 = smov 0   ;;  %s1631_s18 = smov 0  }
   0x5   :  { %s1633_s19 = smov 0   ;;  %s1635_s20 = smov 0  }
   0x6 LB: > { %s1340_s21 = sadd.s32 4294967295, %s1594_s20   ;;  %s1341_s22 = sadd.s32 4294967294, %s1594_s20   ;;  %s1594_s20 = sphi %s1635_s20, %s21_s20   ;;  %s1590_s19 = sphi %s1633_s19, %s2321_s19   ;;  %s1586_s18 = sphi %s1631_s18, %s2320_s18   ;;  %s1582_s17 = sphi %s1629_s17, %s2319_s17   ;;  %s1578_s16 = sphi %s1627_s16, %s2318_s16   ;;  %s1574_s15 = sphi %s1625_s15, %s2317_s15  }
   0x7   : > { %s33_s23 = sadd.s32 1, %s1590_s19  ;;  %s120_s24 = sadd.s32 1, %s1582_s17 }
   0x8   : > { %p35_p0 = scmp.ge.s32.totalorder %s33_s23, 2  ;;  %p130_p1 = scmp.ne.s32.totalorder %s1582_s17, %s1578_s16 }
   0x9   : > { %p131_p2 = scmp.eq.s32.totalorder %s1340_s21, 1  ;;  %p136_p3 = scmp.ne.s32.totalorder %s1578_s16, %s1574_s15 }
   0xa   : > { %s2323_s23 = smov (%p35_p0, %s33_s23), 0  ;;  %p137_p5 = scmp.eq.s32.totalorder %s1341_s22, 1 }
   0xb   : > { %p1665_p4 = por %p131_p2, %p130_p1  ;;  %s117_s26 = ssub.s32 %s1590_s19, %s2323_s23 }
   0xc   : > { %p1344_p6 = scmp.ge.s32.totalorder %s1594_s20, 1  ;;  %p118_p7 = scmp.eq.s32.totalorder %s117_s26, 0 }
   0xd   : > { %p1672_p8 = por %p137_p5, %p136_p3  ;;  %p208_p9 = scmp.lt.s32.totalorder %s1594_s20, 3 }
   0xe   : > { %s1678_s28 = scalar_select %p118_p7, %s1582_s17, %s120_s24  }
   0xf   : > { %p209_p10 = pnand %p1344_p6, %p208_p9 }
  0x10   : > { %p250_p11 = scmp.lt.s32.totalorder (!%p209_p10), %s1586_s18, 1  ;;  %vm350_vm0 = vcmask (!%p209_p10), 1042432   ;;  %vm292_vm1 = vcmask (!%p209_p10), 23552   ;;  %vm318_vm2 = vcmask (!%p209_p10), 518144   ;;  %vm475_vm3 = vcmask (!%p209_p10), 523264   ;;  %s2221_s21 = sand.u32 (!%p209_p10), 1, %s1578_s16  }
  0x11   : > { %212 = sbr.rel (%p209_p10) target bundleno = 1402 (0x57a), region = 32  ;;  %s1367_s22 = sshll.u32 (!%p209_p10), %s1586_s18, 4 }
  0x12   : > { %s242_s24 = scalar_lea.vmem (!%p209_p10), [#allocation4], %s2221_s21  ;;  %s1188_s6 = scalar_lea.sflag (!%p209_p10), [#allocation5], %s2221_s21 }
  0x13   : > { %s1204_s26 = sshll.u32 (!%p209_p10), %s242_s24, 4  ;;  %s2232_s26 = int_to_ptr.vmem [resolvable:$true] %s1204_s26 }
  0x14   : > { %s1484_s7 = scalar_lea.vmem (!%p209_p10), %s2232_s26, 16 }
  0x15   : > { %p1485_p12 = scmp.ne.s32.totalorder (!%p209_p10), %s2232_s26, %s1484_s7 }
  0x17   : > { %p1486_p13 = pnand (!%p209_p10), %p1485_p12, %p1665_p4 }
  0x18   : > { %s1682_s29 = scalar_select %p250_p11, %s1586_s18, 1 }
  0x19   : > { %p1487_p0 = pneg %p1486_p13 }
  0x1a   : > { %s1371_s30 = sshll.u32 %s1682_s29, 6  ;;  %s1347_s5 = sshll.u32 %s1682_s29, 2 }
  0x1b   : > { %s257_s8 = scalar_lea.vmem %s2310_s0, %s1371_s30  ;;  %s262_s11 = scalar_lea.vmem %s2311_s1, %s1347_s5 }
  0x1c   : > { %v275_v0 = vld [vmem:[%s262_s11] sm:$0x7]  ;;  %v1696_v2 = vld [vmem:[%s257_s8 + $0x8] sm:$0xff]  ;;  %v1701_v3 = vld [vmem:[%s257_s8 + $0x10] sm:$0xff]  ;;  %s266_s14 = scalar_lea.vmem %s2312_s2, %s1347_s5  ;;  %s2230_s5 = scalar_lea.hbm %s2313_s3, %s1367_s22 }
  0x1d   : > { %v1694_v1 = vld [vmem:[%s257_s8] sm:$0xff]  ;;  %1404 = vmatprep.subr.msk.mxu1 %vm350_vm0, %v275_v0  ;;  %v1710_v4 = vld [vmem:[%s257_s8 + $0x18] sm:$0xff]  ;;  %v1718_v6 = vld [vmem:[%s257_s8 + $0x28] sm:$0xff]  ;;  %v525_v9 = vmul.f32 %v275_v0, %v275_v0 }
  0x1e   : > { %1406 = vmatprep.mubr.msk.f32.mxu1 %vm292_vm1, %v1694_v1  ;;  %1405 = vmatpush3.msk.msra.mxu1 %vm350_vm0, %v275_v0  ;;  %v1712_v5 = vld [vmem:[%s257_s8 + $0x20] sm:$0xff]  ;;  %v1720_v7 = vld [vmem:[%s257_s8 + $0x30] sm:$0xff]  ;;  %v1726_v8 = vld [vmem:[%s257_s8 + $0x38] sm:$0xff]  ;;  %s1598_s8 = smov [#allocation4]  }
  0x1f   : > { %1392 = vmatprep.mubr.msk.f32.mxu0 %vm292_vm1, %v1694_v1  ;;  %1407 = vmatmul.mubr.msk.f32.vlgmr.msra.gmra.mrb[0].mxu1 %vm292_vm1, %v1696_v2  ;;  %v526_v10 = vsel %vm318_vm2, %v525_v9, 0.0  ;;  %s1488_s9 = sshll.u32 %s1598_s8, 4  ;;  %s1489_s9 = int_to_ptr.vmem [resolvable:$false] %s1488_s9 }
  0x20   : > { %1409 = vmatprep.mubr.msk.f32.mxu1 %vm292_vm1, %v1701_v3  ;;  %v527_v11 = vrot.slane %v526_v10, 4  ;;  %s1490_s10 = scalar_lea.vmem %s1489_s9, 32  ;;  %p1491_p1 = scmp.lt.s32.totalorder %s2232_s26, %s1489_s9 }
  0x21   : > { %p1492_p2 = scmp.lt.s32.totalorder %s1490_s10, %s1484_s7 }
  0x22   : > { %v528_v12 = vadd.f32 %v527_v11, %v526_v10 }
  0x23   : > { %1410 = vmatmul.mubr.msk.f32.gmra.mrb[2].mxu1 %vm292_vm1, %v1710_v4  ;;  %p1493_p3 = por %p1492_p2, %p1491_p1 }
  0x24   : > { %1412 = vmatprep.mubr.msk.f32.mxu1 %vm292_vm1, %v1712_v5  ;;  %v529_v13 = vrot.slane %v528_v12, 2 }
  0x25   : > { %p1494_p5 = pnand %p1493_p3, %p1487_p0 }
  0x26   : > { %v530_v14 = vadd.f32 %v529_v13, %v528_v12 }
  0x27   : > { %1413 = vmatmul.mubr.msk.f32.gmra.mrb[4].mxu1 %vm292_vm1, %v1718_v6 }
  0x28   : > { %1415 = vmatprep.mubr.msk.f32.mxu1 %vm292_vm1, %v1720_v7  ;;  %v531_v15 = vrot.slane %v530_v14, 1 }
  0x2a   : > { %v532_v16 = vadd.f32 %v531_v15, %v530_v14 }
  0x2b   : > { %1416 = vmatmul.mubr.msk.f32.gmra.mrb[6].mxu1 %vm292_vm1, %v1726_v8 }
  0xf2   : > { %v1408_v17 = vpop.f32.mrb[0].mxu1 }
  0xf3   : > { %v642_v18 = vmul.f32 2.0, %v1408_v17  ;;  %v602_v19 = vpop.f32.mrb[1].mxu1 }
  0xf4   : > { %v641_v20 = vmul.f32 2.0, %v602_v19 }
  0xf5   : > { %v1731_v21 = vsub.f32 %v532_v16, %v642_v18 }
  0xf6   : > { %v1733_v22 = vsub.f32 %v532_v16, %v641_v20  ;;  %v1411_v23 = vpop.f32.mrb[2].mxu1 }
  0xf7   : > { %v644_v24 = vmul.f32 2.0, %v1411_v23  ;;  %v612_v25 = vpop.f32.mrb[3].mxu1  ;;  %vm658_vm5 = vcmp.gt.f32.partialorder %v1731_v21, -inf }
  0xf8   : > { %v643_v26 = vmul.f32 2.0, %v612_v25  ;;  %vm657_vm4 = vcmp.gt.f32.partialorder %v1733_v22, -inf  ;;  %v666_v34 = vsel %vm658_vm5, %v1731_v21, inf }
  0xf9   : > { %v1737_v27 = vsub.f32 %v532_v16, %v644_v24  ;;  %v665_v28 = vsel %vm657_vm4, %v1733_v22, inf  ;;  %v676_v40 = vsel %vm475_vm3, %v666_v34, inf }
  0xfa   : > { %v1740_v29 = vsub.f32 %v532_v16, %v643_v26  ;;  %v1414_v30 = vpop.f32.mrb[4].mxu1  ;;  %v673_v31 = vsel %vm475_vm3, %v665_v28, inf }
  0xfb   : > { %v646_v32 = vmul.f32 2.0, %v1414_v30  ;;  %674 = vmin.xlane.f32.xlu0 %v673_v31  ;;  %v622_v33 = vpop.f32.mrb[5].mxu1  ;;  %vm660_vm7 = vcmp.gt.f32.partialorder %v1737_v27, -inf }
  0xfc   : > { %v645_v35 = vmul.f32 2.0, %v622_v33  ;;  %vm659_vm6 = vcmp.gt.f32.partialorder %v1740_v29, -inf  ;;  %v668_v44 = vsel %vm660_vm7, %v1737_v27, inf }
  0xfd   : > { %v1746_v36 = vsub.f32 %v532_v16, %v646_v32  ;;  %v667_v37 = vsel %vm659_vm6, %v1740_v29, inf  ;;  %v682_v50 = vsel %vm475_vm3, %v668_v44, inf }
  0xfe   : > { %v1749_v38 = vsub.f32 %v532_v16, %v645_v35  ;;  %v1417_v39 = vpop.f32.mrb[6].mxu1  ;;  %v679_v41 = vsel %vm475_vm3, %v667_v37, inf }
  0xff   : > { %v648_v42 = vmul.f32 2.0, %v1417_v39  ;;  %677 = vmin.xlane.f32.xlu0 %v676_v40  ;;  %680 = vmin.xlane.f32.xlu1 %v679_v41  ;;  %v632_v43 = vpop.f32.mrb[7].mxu1  ;;  %vm662_vm8 = vcmp.gt.f32.partialorder %v1746_v36, -inf }
 0x100   : > { %v647_v45 = vmul.f32 2.0, %v632_v43  ;;  %vm661_vm9 = vcmp.gt.f32.partialorder %v1749_v38, -inf  ;;  %v670_v48 = vsel %vm662_vm8, %v1746_v36, inf }
 0x101   : > { %v1756_v46 = vsub.f32 %v532_v16, %v648_v42  ;;  %v669_v47 = vsel %vm661_vm9, %v1749_v38, inf  ;;  %v688_v52 = vsel %vm475_vm3, %v670_v48, inf }
 0x102   : > { %v1760_v49 = vsub.f32 %v532_v16, %v647_v45  ;;  %v685_v51 = vsel %vm475_vm3, %v669_v47, inf }
 0x103   : > { %683 = vmin.xlane.f32.xlu1 %v682_v50  ;;  %686 = vmin.xlane.f32.xlu0 %v685_v51  ;;  %vm664_vm10 = vcmp.gt.f32.partialorder %v1756_v46, -inf }
 0x104   : > { %vm663_vm11 = vcmp.gt.f32.partialorder %v1760_v49, -inf  ;;  %v672_v54 = vsel %vm664_vm10, %v1756_v46, inf }
 0x105   : > { %v671_v53 = vsel %vm663_vm11, %v1760_v49, inf  ;;  %v694_v56 = vsel %vm475_vm3, %v672_v54, inf }
 0x106   : > { %v691_v55 = vsel %vm475_vm3, %v671_v53, inf }
 0x107   : > { %689 = vmin.xlane.f32.xlu1 %v688_v52  ;;  %692 = vmin.xlane.f32.xlu0 %v691_v55 }
 0x10b   : > { %695 = vmin.xlane.f32.xlu1 %v694_v56 }
 0x188   : > { %v675_v57 = vpop.xlane.xlu0 %674 }
 0x189   : > { %vm697_vm12 = vcmp.gt.f32.partialorder %v1733_v22, %v675_v57  ;;  %v1839_v57 = vld [vmem:[%s266_s14] sm:$0x7] }
 0x18a   : > { %v705_v58 = vsel %vm697_vm12, %v1733_v22, inf  ;;  %1390 = vmatprep.subr.msk.mxu0 %vm350_vm0, %v1839_v57 }
 0x18b   : > { %v713_v59 = vsel %vm475_vm3, %v705_v58, inf  ;;  %1391 = vmatpush3.msk.msra.mxu0 %vm350_vm0, %v1839_v57 }
 0x18c   : > { %v678_v60 = vpop.xlane.xlu0 %677  ;;  %v681_v61 = vpop.xlane.xlu1 %680  ;;  %714 = vmin.xlane.f32.xlu0 %v713_v59  ;;  %1393 = vmatmul.mubr.msk.f32.vlgmr.msra.gmra.mrb[0].mxu0 %vm292_vm1, %v1696_v2 }
 0x18d   : > { %vm698_vm13 = vcmp.gt.f32.partialorder %v1731_v21, %v678_v60  ;;  %vm699_vm14 = vcmp.gt.f32.partialorder %v1740_v29, %v681_v61  ;;  %1395 = vmatprep.mubr.msk.f32.mxu0 %vm292_vm1, %v1701_v3 }
 0x18e   : > { %v706_v62 = vsel %vm698_vm13, %v1731_v21, inf  ;;  %v707_v63 = vsel %vm699_vm14, %v1740_v29, inf }
 0x18f   : > { %v716_v0 = vsel %vm475_vm3, %v706_v62, inf  ;;  %v719_v9 = vsel %vm475_vm3, %v707_v63, inf }
 0x190   : > { %v684_v10 = vpop.xlane.xlu1 %683  ;;  %v687_v11 = vpop.xlane.xlu0 %686  ;;  %717 = vmin.xlane.f32.xlu1 %v716_v0  ;;  %720 = vmin.xlane.f32.xlu0 %v719_v9 }
 0x191   : > { %vm700_vm15 = vcmp.gt.f32.partialorder %v1737_v27, %v684_v10  ;;  %vm701_vm4 = vcmp.gt.f32.partialorder %v1749_v38, %v687_v11  ;;  %1396 = vmatmul.mubr.msk.f32.gmra.mrb[2].mxu0 %vm292_vm1, %v1710_v4 }
 0x192   : > { %v708_v12 = vsel %vm700_vm15, %v1737_v27, inf  ;;  %v709_v13 = vsel %vm701_vm4, %v1749_v38, inf  ;;  %1398 = vmatprep.mubr.msk.f32.mxu0 %vm292_vm1, %v1712_v5 }
 0x193   : > { %v722_v14 = vsel %vm475_vm3, %v708_v12, inf  ;;  %v725_v15 = vsel %vm475_vm3, %v709_v13, inf }
 0x194   : > { %v690_v16 = vpop.xlane.xlu1 %689  ;;  %723 = vmin.xlane.f32.xlu1 %v722_v14  ;;  %726 = vmin.xlane.f32.xlu0 %v725_v15  ;;  %v693_v17 = vpop.xlane.xlu0 %692 }
 0x195   : > { %vm702_vm5 = vcmp.gt.f32.partialorder %v1746_v36, %v690_v16  ;;  %vm703_vm6 = vcmp.gt.f32.partialorder %v1760_v49, %v693_v17  ;;  %1399 = vmatmul.mubr.msk.f32.gmra.mrb[4].mxu0 %vm292_vm1, %v1718_v6 }
 0x196   : > { %v710_v18 = vsel %vm702_vm5, %v1746_v36, inf  ;;  %v711_v19 = vsel %vm703_vm6, %v1760_v49, inf  ;;  %1401 = vmatprep.mubr.msk.f32.mxu0 %vm292_vm1, %v1720_v7 }
 0x197   : > { %v728_v20 = vsel %vm475_vm3, %v710_v18, inf  ;;  %v731_v23 = vsel %vm475_vm3, %v711_v19, inf }
 0x198   : > { %729 = vmin.xlane.f32.xlu1 %v728_v20  ;;  %v696_v24 = vpop.xlane.xlu1 %695  ;;  %732 = vmin.xlane.f32.xlu0 %v731_v23 }
 0x199   : > { %vm704_vm7 = vcmp.gt.f32.partialorder %v1756_v46, %v696_v24  ;;  %1402 = vmatmul.mubr.msk.f32.gmra.mrb[6].mxu0 %vm292_vm1, %v1726_v8 }
 0x19a   : > { %v712_v25 = vsel %vm704_vm7, %v1756_v46, inf }
 0x19b   : > { %v734_v26 = vsel %vm475_vm3, %v712_v25, inf }
 0x19c   : > { %735 = vmin.xlane.f32.xlu1 %v734_v26 }
 0x219   : > { %v715_v28 = vpop.xlane.xlu0 %714 }
 0x21a   : > { %vm761_vm8 = vcmp.gt.f32.partialorder %v1733_v22, %v715_v28  ;;  %vm737_vm0 = vcmp.lt.f32.partialorder %v715_v28, inf }
 0x21b   : > { %v769_v30 = vsel %vm761_vm8, %v1733_v22, inf  ;;  %v745_v59 = vsel %vm737_vm0, %v715_v28, 0.0 }
 0x21c   : > { %v777_v31 = vsel %vm475_vm3, %v769_v30, inf }
 0x21d   : > { %v718_v32 = vpop.xlane.xlu1 %717  ;;  %778 = vmin.xlane.f32.xlu0 %v777_v31  ;;  %v721_v33 = vpop.xlane.xlu0 %720 }
 0x21e   : > { %vm762_vm9 = vcmp.gt.f32.partialorder %v1731_v21, %v718_v32  ;;  %vm763_vm10 = vcmp.gt.f32.partialorder %v1740_v29, %v721_v33  ;;  %vm738_vm4 = vcmp.lt.f32.partialorder %v718_v32, inf  ;;  %vm739_vm5 = vcmp.lt.f32.partialorder %v721_v33, inf }
 0x21f   : > { %v770_v34 = vsel %vm762_vm9, %v1731_v21, inf  ;;  %v771_v35 = vsel %vm763_vm10, %v1740_v29, inf  ;;  %v746_v0 = vsel %vm738_vm4, %v718_v32, 0.0  ;;  %v747_v9 = vsel %vm739_vm5, %v721_v33, 0.0 }
 0x220   : > { %v780_v37 = vsel %vm475_vm3, %v770_v34, inf  ;;  %v783_v39 = vsel %vm475_vm3, %v771_v35, inf }
 0x221   : > { %781 = vmin.xlane.f32.xlu1 %v780_v37  ;;  %v1804_v40 = vpop.xlane.xlu1 %723  ;;  %784 = vmin.xlane.f32.xlu0 %v783_v39  ;;  %v1806_v41 = vpop.xlane.xlu0 %726 }
 0x222   : > { %vm764_vm11 = vcmp.gt.f32.partialorder %v1737_v27, %v1804_v40  ;;  %vm765_vm12 = vcmp.gt.f32.partialorder %v1749_v38, %v1806_v41  ;;  %vm740_vm8 = vcmp.lt.f32.partialorder %v1804_v40, inf  ;;  %vm741_vm9 = vcmp.lt.f32.partialorder %v1806_v41, inf }
 0x223   : > { %v772_v42 = vsel %vm764_vm11, %v1737_v27, inf  ;;  %v773_v43 = vsel %vm765_vm12, %v1749_v38, inf  ;;  %v748_v20 = vsel %vm740_vm8, %v1804_v40, 0.0  ;;  %v749_v23 = vsel %vm741_vm9, %v1806_v41, 0.0 }
 0x224   : > { %v786_v44 = vsel %vm475_vm3, %v772_v42, inf  ;;  %v789_v45 = vsel %vm475_vm3, %v773_v43, inf }
 0x225   : > { %787 = vmin.xlane.f32.xlu1 %v786_v44  ;;  %v1816_v47 = vpop.xlane.xlu1 %729  ;;  %790 = vmin.xlane.f32.xlu0 %v789_v45  ;;  %v1818_v48 = vpop.xlane.xlu0 %732 }
 0x226   : > { %vm766_vm13 = vcmp.gt.f32.partialorder %v1746_v36, %v1816_v47  ;;  %vm767_vm14 = vcmp.gt.f32.partialorder %v1760_v49, %v1818_v48 }
 0x227   : > { %v774_v50 = vsel %vm766_vm13, %v1746_v36, inf  ;;  %v775_v51 = vsel %vm767_vm14, %v1760_v49, inf  ;;  %vm742_vm14 = vcmp.lt.f32.partialorder %v1816_v47, inf }
 0x228   : > { %v792_v52 = vsel %vm475_vm3, %v774_v50, inf  ;;  %v795_v53 = vsel %vm475_vm3, %v775_v51, inf  ;;  %v750_v40 = vsel %vm742_vm14, %v1816_v47, 0.0 }
 0x229   : > { %793 = vmin.xlane.f32.xlu1 %v792_v52  ;;  %v1828_v54 = vpop.xlane.xlu1 %735  ;;  %796 = vmin.xlane.f32.xlu0 %v795_v53 }
 0x22a   : > { %vm768_vm15 = vcmp.gt.f32.partialorder %v1756_v46, %v1828_v54 }
 0x22b   : > { %v776_v55 = vsel %vm768_vm15, %v1756_v46, inf }
 0x22c   : > { %v798_v56 = vsel %vm475_vm3, %v776_v55, inf }
 0x22d   : > { %799 = vmin.xlane.f32.xlu1 %v798_v56 }
 0x2aa   : > { %v779_v58 = vpop.xlane.xlu0 %778 }
 0x2ab   : > { %vm801_vm6 = vcmp.lt.f32.partialorder %v779_v58, inf  ;;  %vm825_vm7 = vcmp.gt.f32.partialorder %v1733_v22, %v779_v58 }
 0x2ac   : > { %v809_v60 = vsel %vm801_vm6, %v779_v58, 0.0  ;;  %v833_v61 = vsel %vm825_vm7, %v1733_v22, inf }
 0x2ad   : > { %v1861_v62 = vadd.f32 %v809_v60, %v745_v59  ;;  %v841_v63 = vsel %vm475_vm3, %v833_v61, inf }
 0x2ae   : > { %v782_v10 = vpop.xlane.xlu1 %781  ;;  %842 = vmin.xlane.f32.xlu0 %v841_v63  ;;  %v785_v11 = vpop.xlane.xlu0 %784 }
 0x2af   : > { %vm802_vm10 = vcmp.lt.f32.partialorder %v782_v10, inf  ;;  %vm803_vm11 = vcmp.lt.f32.partialorder %v785_v11, inf  ;;  %vm826_vm12 = vcmp.gt.f32.partialorder %v1731_v21, %v782_v10  ;;  %vm827_vm13 = vcmp.gt.f32.partialorder %v1740_v29, %v785_v11 }
 0x2b0   : > { %v810_v12 = vsel %vm802_vm10, %v782_v10, 0.0  ;;  %v811_v13 = vsel %vm803_vm11, %v785_v11, 0.0  ;;  %v834_v14 = vsel %vm826_vm12, %v1731_v21, inf  ;;  %v835_v15 = vsel %vm827_vm13, %v1740_v29, inf }
 0x2b1   : > { %v818_v16 = vadd.f32 %v810_v12, %v746_v0  ;;  %v819_v17 = vadd.f32 %v811_v13, %v747_v9  ;;  %v844_v18 = vsel %vm475_vm3, %v834_v14, inf  ;;  %v847_v19 = vsel %vm475_vm3, %v835_v15, inf }
 0x2b2   : > { %845 = vmin.xlane.f32.xlu1 %v844_v18  ;;  %v788_v24 = vpop.xlane.xlu1 %787  ;;  %848 = vmin.xlane.f32.xlu0 %v847_v19  ;;  %v791_v25 = vpop.xlane.xlu0 %790 }
 0x2b3   : > { %vm804_vm15 = vcmp.lt.f32.partialorder %v788_v24, inf  ;;  %vm805_vm0 = vcmp.lt.f32.partialorder %v791_v25, inf  ;;  %vm828_vm4 = vcmp.gt.f32.partialorder %v1737_v27, %v788_v24  ;;  %vm829_vm5 = vcmp.gt.f32.partialorder %v1749_v38, %v791_v25 }
 0x2b4   : > { %v812_v26 = vsel %vm804_vm15, %v788_v24, 0.0  ;;  %v813_v28 = vsel %vm805_vm0, %v791_v25, 0.0  ;;  %v836_v30 = vsel %vm828_vm4, %v1737_v27, inf  ;;  %v837_v31 = vsel %vm829_vm5, %v1749_v38, inf }
 0x2b5   : > { %v820_v32 = vadd.f32 %v812_v26, %v748_v20  ;;  %v821_v33 = vadd.f32 %v813_v28, %v749_v23  ;;  %v850_v34 = vsel %vm475_vm3, %v836_v30, inf  ;;  %v853_v35 = vsel %vm475_vm3, %v837_v31, inf }
 0x2b6   : > { %851 = vmin.xlane.f32.xlu1 %v850_v34  ;;  %v794_v37 = vpop.xlane.xlu1 %793  ;;  %854 = vmin.xlane.f32.xlu0 %v853_v35  ;;  %v1885_v39 = vpop.xlane.xlu0 %796  ;;  %v317_v30 = vmul.f32 %v1839_v57, %v1839_v57  ;;  %v285_v57 = vmul.f32 %v1696_v2, %v1696_v2 }
 0x2b7   : > { %vm806_vm6 = vcmp.lt.f32.partialorder %v794_v37, inf  ;;  %vm830_vm7 = vcmp.gt.f32.partialorder %v1746_v36, %v794_v37  ;;  %vm831_vm8 = vcmp.gt.f32.partialorder %v1760_v49, %v1885_v39 }
 0x2b8   : > { %v814_v41 = vsel %vm806_vm6, %v794_v37, 0.0  ;;  %v838_v42 = vsel %vm830_vm7, %v1746_v36, inf  ;;  %v839_v43 = vsel %vm831_vm8, %v1760_v49, inf }
 0x2b9   : > { %v822_v44 = vadd.f32 %v814_v41, %v750_v40  ;;  %v856_v45 = vsel %vm475_vm3, %v838_v42, inf  ;;  %v859_v50 = vsel %vm475_vm3, %v839_v43, inf  ;;  %v284_v41 = vmul.f32 %v1694_v1, %v1694_v1 }
 0x2ba   : > { %857 = vmin.xlane.f32.xlu1 %v856_v45  ;;  %v1897_v51 = vpop.xlane.xlu1 %799  ;;  %860 = vmin.xlane.f32.xlu0 %v859_v50  ;;  %v319_v42 = vsel %vm318_vm2, %v317_v30, 0.0  ;;  %v286_v1 = vmul.f32 %v1701_v3, %v1701_v3 }
 0x2bb   : > { %vm832_vm9 = vcmp.gt.f32.partialorder %v1756_v46, %v1897_v51  ;;  %v320_v50 = vrot.slane %v319_v42, 4 }
 0x2bc   : > { %v840_v52 = vsel %vm832_vm9, %v1756_v46, inf  ;;  %v299_v2 = vsel %vm292_vm1, %v286_v1, 0.0 }
 0x2bd   : > { %v862_v47 = vsel %vm475_vm3, %v840_v52, inf  ;;  %v296_v52 = vsel %vm292_vm1, %v285_v57, 0.0 }
 0x2be   : > { %863 = vmin.xlane.f32.xlu1 %v862_v47  ;;  %v321_v47 = vadd.f32 %v320_v50, %v319_v42 }
 0x33b   : > { %v843_v53 = vpop.xlane.xlu0 %842 }
 0x33c   : > { %vm865_vm10 = vcmp.lt.f32.partialorder %v843_v53, inf  ;;  %vm889_vm11 = vcmp.gt.f32.partialorder %v1733_v22, %v843_v53 }
 0x33d   : > { %v873_v55 = vsel %vm865_vm10, %v843_v53, 0.0  ;;  %v897_v56 = vsel %vm889_vm11, %v1733_v22, inf  ;;  %v322_v53 = vrot.slane %v321_v47, 2 }
 0x33e   : > { %v1906_v58 = vadd.f32 %v873_v55, %v1861_v62  ;;  %v905_v59 = vsel %vm475_vm3, %v897_v56, inf }
 0x33f   : > { %v846_v60 = vpop.xlane.xlu1 %845  ;;  %906 = vmin.xlane.f32.xlu0 %v905_v59  ;;  %v849_v61 = vpop.xlane.xlu0 %848  ;;  %v323_v55 = vadd.f32 %v322_v53, %v321_v47 }
 0x340   : > { %vm866_vm12 = vcmp.lt.f32.partialorder %v846_v60, inf  ;;  %vm867_vm13 = vcmp.lt.f32.partialorder %v849_v61, inf  ;;  %vm890_vm14 = vcmp.gt.f32.partialorder %v1731_v21, %v846_v60  ;;  %vm891_vm15 = vcmp.gt.f32.partialorder %v1740_v29, %v849_v61 }
 0x341   : > { %v874_v63 = vsel %vm866_vm12, %v846_v60, 0.0  ;;  %v875_v0 = vsel %vm867_vm13, %v849_v61, 0.0  ;;  %v898_v9 = vsel %vm890_vm14, %v1731_v21, inf  ;;  %v899_v10 = vsel %vm891_vm15, %v1740_v29, inf  ;;  %v1394_v60 = vpop.f32.mrb[0].mxu0 }
 0x342   : > { %v1913_v11 = vadd.f32 %v874_v63, %v818_v16  ;;  %v1915_v62 = vadd.f32 %v875_v0, %v819_v17  ;;  %v908_v12 = vsel %vm475_vm3, %v898_v9, inf  ;;  %v911_v13 = vsel %vm475_vm3, %v899_v10, inf  ;;  %v420_v63 = vpop.f32.mrb[1].mxu0 }
 0x343   : > { %909 = vmin.xlane.f32.xlu1 %v908_v12  ;;  %v852_v14 = vpop.xlane.xlu1 %851  ;;  %912 = vmin.xlane.f32.xlu0 %v911_v13  ;;  %v855_v15 = vpop.xlane.xlu0 %854  ;;  %v324_v56 = vrot.slane %v323_v55, 1  ;;  %v1960_v61 = vmul.f32 2.0, %v1394_v60  ;;  %v1964_v9 = vmul.f32 2.0, %v420_v63  ;;  %v287_v63 = vmul.f32 %v1710_v4, %v1710_v4 }
 0x344   : > { %vm868_vm0 = vcmp.lt.f32.partialorder %v852_v14, inf  ;;  %vm869_vm4 = vcmp.lt.f32.partialorder %v855_v15, inf  ;;  %vm892_vm5 = vcmp.gt.f32.partialorder %v1737_v27, %v852_v14  ;;  %vm893_vm6 = vcmp.gt.f32.partialorder %v1749_v38, %v855_v15  ;;  %v1397_v3 = vpop.f32.mrb[2].mxu0 }
 0x345   : > { %v876_v18 = vsel %vm868_vm0, %v852_v14, 0.0  ;;  %v877_v19 = vsel %vm869_vm4, %v855_v15, 0.0  ;;  %v900_v16 = vsel %vm892_vm5, %v1737_v27, inf  ;;  %v901_v17 = vsel %vm893_vm6, %v1749_v38, inf  ;;  %v430_v12 = vpop.f32.mrb[3].mxu0 }
 0x346   : > { %v1923_v20 = vadd.f32 %v876_v18, %v820_v32  ;;  %v1925_v23 = vadd.f32 %v877_v19, %v821_v33  ;;  %v914_v24 = vsel %vm475_vm3, %v900_v16, inf  ;;  %v917_v25 = vsel %vm475_vm3, %v901_v17, inf  ;;  %v1400_v15 = vpop.f32.mrb[4].mxu0 }
 0x347   : > { %915 = vmin.xlane.f32.xlu1 %v914_v24  ;;  %v858_v26 = vpop.xlane.xlu1 %857  ;;  %918 = vmin.xlane.f32.xlu0 %v917_v25  ;;  %v1929_v28 = vpop.xlane.xlu0 %860  ;;  %v1958_v59 = vadd.f32 %v324_v56, %v323_v55  ;;  %v1966_v10 = vmul.f32 2.0, %v1397_v3  ;;  %v1970_v14 = vmul.f32 2.0, %v430_v12  ;;  %v1974_v19 = vmul.f32 2.0, %v1400_v15 }
 0x348   : > { %vm870_vm7 = vcmp.lt.f32.partialorder %v858_v26, inf  ;;  %vm894_vm8 = vcmp.gt.f32.partialorder %v1746_v36, %v858_v26  ;;  %vm895_vm9 = vcmp.gt.f32.partialorder %v1760_v49, %v1929_v28  ;;  %v440_v16 = vpop.f32.mrb[5].mxu0  ;;  %v302_v4 = vsel %vm292_vm1, %v287_v63, 0.0 }
 0x349   : > { %v878_v31 = vsel %vm870_vm7, %v858_v26, 0.0  ;;  %v902_v32 = vsel %vm894_vm8, %v1746_v36, inf  ;;  %v903_v33 = vsel %vm895_vm9, %v1760_v49, inf  ;;  %v468_v0 = vsub.f32 %v1958_v59, %v1960_v61  ;;  %v1403_v25 = vpop.f32.mrb[6].mxu0 }
 0x34a   : > { %v1938_v34 = vadd.f32 %v878_v31, %v822_v44  ;;  %v920_v35 = vsel %vm475_vm3, %v902_v32, inf  ;;  %v923_v37 = vsel %vm475_vm3, %v903_v33, inf  ;;  %v293_v44 = vsel %vm292_vm1, %v284_v41, 0.0  ;;  %v450_v31 = vpop.f32.mrb[7].mxu0 }
 0x34b   : > { %921 = vmin.xlane.f32.xlu1 %v920_v35  ;;  %v1942_v40 = vpop.xlane.xlu1 %863  ;;  %924 = vmin.xlane.f32.xlu0 %v923_v37  ;;  %v470_v13 = vsub.f32 %v1958_v59, %v1966_v10  ;;  %v467_v18 = vsub.f32 %v1958_v59, %v1964_v9  ;;  %v472_v17 = vsub.f32 %v1958_v59, %v1974_v19  ;;  %v1978_v24 = vmul.f32 2.0, %v440_v16 }
 0x34c   : > { %vm896_vm10 = vcmp.gt.f32.partialorder %v1756_v46, %v1942_v40  ;;  %v469_v26 = vsub.f32 %v1958_v59, %v1970_v14  ;;  %v1982_v30 = vmul.f32 2.0, %v1403_v25  ;;  %v1986_v33 = vmul.f32 2.0, %v450_v31 }
 0x34d   : > { %v904_v43 = vsel %vm896_vm10, %v1756_v46, inf  ;;  %v471_v35 = vsub.f32 %v1958_v59, %v1978_v24  ;;  %v288_v16 = vmul.f32 %v1712_v5, %v1712_v5  ;;  %v289_v5 = vmul.f32 %v1718_v6, %v1718_v6 }
 0x34e   : > { %v926_v45 = vsel %vm475_vm3, %v904_v43, inf  ;;  %v474_v32 = vsub.f32 %v1958_v59, %v1982_v30  ;;  %v473_v37 = vsub.f32 %v1958_v59, %v1986_v33  ;;  %v491_v61 = vsel %vm475_vm3, %v472_v17, inf }
 0x34f   : > { %927 = vmin.xlane.f32.xlu1 %v926_v45  ;;  %294 = vadd.xlane.f32.xlu0 %v293_v44  ;;  %v488_v10 = vsel %vm475_vm3, %v471_v35, inf  ;;  %v1596_v14 = vmov 0.0  }
 0x350   : > { %v497_v9 = vsel %vm475_vm3, %v474_v32, inf }
 0x353   : > { %297 = vadd.xlane.f32.xlu1 %v296_v52 }
 0x357   : > { %300 = vadd.xlane.f32.xlu1 %v299_v2 }
 0x3cc   : > { %v907_v41 = vpop.xlane.xlu0 %906 }
 0x3cd   : > { %vm929_vm2 = vcmp.lt.f32.partialorder %v907_v41, inf  ;;  %vm953_vm11 = vcmp.gt.f32.partialorder %v1733_v22, %v907_v41 }
 0x3ce   : > { %v937_v57 = vsel %vm929_vm2, %v907_v41, 0.0  ;;  %v961_v42 = vsel %vm953_vm11, %v1733_v22, inf }
 0x3cf   : > { %v1995_v43 = vadd.f32 %v937_v57, %v1906_v58  ;;  %v969_v44 = vsel %vm475_vm3, %v961_v42, inf  ;;  %v305_v57 = vsel %vm292_vm1, %v288_v16, 0.0 }
 0x3d0   : > { %v910_v45 = vpop.xlane.xlu1 %909  ;;  %v913_v50 = vpop.xlane.xlu0 %912  ;;  %970 = vmin.xlane.f32.xlu0 %v969_v44  ;;  %v308_v44 = vsel %vm292_vm1, %v289_v5, 0.0 }
 0x3d1   : > { %vm930_vm12 = vcmp.lt.f32.partialorder %v910_v45, inf  ;;  %vm931_vm13 = vcmp.lt.f32.partialorder %v913_v50, inf  ;;  %vm954_vm14 = vcmp.gt.f32.partialorder %v1731_v21, %v910_v45  ;;  %vm955_vm15 = vcmp.gt.f32.partialorder %v1740_v29, %v913_v50 }
 0x3d2   : > { %v938_v52 = vsel %vm930_vm12, %v910_v45, 0.0  ;;  %v939_v1 = vsel %vm931_vm13, %v913_v50, 0.0  ;;  %v962_v47 = vsel %vm954_vm14, %v1731_v21, inf  ;;  %v963_v22 = vsel %vm955_vm15, %v1740_v29, inf }
 0x3d3   : > { %v2003_v58 = vadd.f32 %v938_v52, %v1913_v11  ;;  %v2006_v2 = vadd.f32 %v939_v1, %v1915_v62  ;;  %v972_v53 = vsel %vm475_vm3, %v962_v47, inf  ;;  %v975_v55 = vsel %vm475_vm3, %v963_v22, inf }
 0x3d4   : > { %973 = vmin.xlane.f32.xlu1 %v972_v53  ;;  %v916_v56 = vpop.xlane.xlu1 %915  ;;  %v919_v60 = vpop.xlane.xlu0 %918  ;;  %976 = vmin.xlane.f32.xlu0 %v975_v55  ;;  %v290_v52 = vmul.f32 %v1720_v7, %v1720_v7  ;;  %v476_v7 = vsel %vm475_vm3, %v467_v18, inf  ;;  %v1597_v18 = vmov 0   ;;  %vm1034_vm12 = vcmask 7168  }
 0x3d5   : > { %vm932_vm0 = vcmp.lt.f32.partialorder %v916_v56, inf  ;;  %vm933_vm4 = vcmp.lt.f32.partialorder %v919_v60, inf  ;;  %vm956_vm5 = vcmp.gt.f32.partialorder %v1737_v27, %v916_v56  ;;  %vm957_vm8 = vcmp.gt.f32.partialorder %v1749_v38, %v919_v60  ;;  %1480 = vset.pattern.permute.xlu0 %v1597_v18  ;;  %1481 = vset.pattern.permute.xlu1 %v1597_v18 }
 0x3d6   : > { %v940_v21 = vsel %vm932_vm0, %v916_v56, 0.0  ;;  %v941_v29 = vsel %vm933_vm4, %v919_v60, 0.0  ;;  %v964_v11 = vsel %vm956_vm5, %v1737_v27, inf  ;;  %v965_v41 = vsel %vm957_vm8, %v1749_v38, inf }
 0x3d7   : > { %v2015_v62 = vadd.f32 %v940_v21, %v1923_v20  ;;  %v2018_v3 = vadd.f32 %v941_v29, %v1925_v23  ;;  %v978_v12 = vsel %vm475_vm3, %v964_v11, inf  ;;  %v291_v38 = vmul.f32 %v1726_v8, %v1726_v8 }
 0x3d8   : > { %979 = vmin.xlane.f32.xlu1 %v978_v12  ;;  %v922_v15 = vpop.xlane.xlu1 %921  ;;  %v2026_v20 = vpop.xlane.xlu0 %924  ;;  %v479_v8 = vsel %vm475_vm3, %v468_v0, inf  ;;  %v311_v1 = vsel %vm292_vm1, %v290_v52, 0.0  ;;  %v482_v0 = vsel %vm475_vm3, %v469_v26, inf  ;;  %vm807_vm14 = vcmp.lt.f32.partialorder %v1885_v39, inf }
 0x3d9   : > { %vm934_vm6 = vcmp.lt.f32.partialorder %v922_v15, inf  ;;  %vm958_vm7 = vcmp.gt.f32.partialorder %v1746_v36, %v922_v15  ;;  %vm959_vm9 = vcmp.gt.f32.partialorder %v1760_v49, %v2026_v20  ;;  %v314_v50 = vsel %vm292_vm1, %v291_v38, 0.0 }
 0x3da   : > { %v942_v27 = vsel %vm934_vm6, %v922_v15, 0.0  ;;  %v966_v23 = vsel %vm958_vm7, %v1746_v36, inf  ;;  %v981_v36 = vsel %vm475_vm3, %v965_v41, inf  ;;  %vm282_vm1 = vcmask 0  }
 0x3db   : > { %v2030_v25 = vadd.f32 %v942_v27, %v1938_v34  ;;  %v984_v31 = vsel %vm475_vm3, %v966_v23, inf  ;;  %v967_v34 = vsel %vm959_vm9, %v1760_v49, inf  ;;  %283 = vst.msk [vmem:[#allocation2] sm:$0x1] %vm282_vm1, %v1596_v14  ;;  %vm743_vm15 = vcmp.lt.f32.partialorder %v1818_v48, inf }
 0x3dc   : > { %303 = vadd.xlane.f32.xlu1 %v302_v4  ;;  %985 = vmin.xlane.f32.xlu0 %v984_v31  ;;  %v2039_v42 = vpop.xlane.xlu1 %927  ;;  %v987_v6 = vsel %vm475_vm3, %v967_v34, inf  ;;  %v2091_v17 = vpop.xlane.xlu0 %294  ;;  %vm871_vm0 = vcmp.lt.f32.partialorder %v1929_v28, inf  ;;  %v815_v12 = vsel %vm807_vm14, %v1885_v39, 0.0  ;;  %vm808_vm5 = vcmp.lt.f32.partialorder %v1897_v51, inf }
 0x3dd   : > { %vm960_vm10 = vcmp.gt.f32.partialorder %v1756_v46, %v2039_v42  ;;  %vm935_vm6 = vcmp.lt.f32.partialorder %v2026_v20, inf  ;;  %v751_v4 = vsel %vm743_vm15, %v1818_v48, 0.0  ;;  %v879_v16 = vsel %vm871_vm0, %v1929_v28, 0.0 }
 0x3de   : > { %v968_v45 = vsel %vm960_vm10, %v1756_v46, inf  ;;  %v485_v46 = vsel %vm475_vm3, %v470_v13, inf  ;;  %v494_v13 = vsel %vm475_vm3, %v473_v37, inf  ;;  %vm744_vm7 = vcmp.lt.f32.partialorder %v1828_v54, inf }
 0x3df   : > { %v990_v49 = vsel %vm475_vm3, %v968_v45, inf  ;;  %v823_v39 = vadd.f32 %v815_v12, %v751_v4  ;;  %vm872_vm8 = vcmp.lt.f32.partialorder %v1942_v40, inf  ;;  %v943_v5 = vsel %vm935_vm6, %v2026_v20, 0.0 }
 0x3e0   : > { %306 = vadd.xlane.f32.xlu1 %v305_v57  ;;  %982 = vmin.xlane.f32.xlu0 %v981_v36  ;;  %v2089_v19 = vpop.xlane.xlu1 %297  ;;  %v816_v57 = vsel %vm808_vm5, %v1897_v51, 0.0  ;;  %v752_v36 = vsel %vm744_vm7, %v1828_v54, 0.0  ;;  %vm936_vm10 = vcmp.lt.f32.partialorder %v2039_v42, inf  ;;  %v880_v38 = vsel %vm872_vm8, %v1942_v40, 0.0 }
 0x3e1   : > { %v887_v48 = vadd.f32 %v879_v16, %v823_v39 }
 0x3e3   : > { %v951_v51 = vadd.f32 %v943_v5, %v887_v48 }
 0x3e4   : > { %309 = vadd.xlane.f32.xlu1 %v308_v44  ;;  %988 = vmin.xlane.f32.xlu0 %v987_v6  ;;  %v2093_v24 = vpop.xlane.xlu1 %300  ;;  %v824_v44 = vadd.f32 %v816_v57, %v752_v36 }
 0x3e8   : > { %315 = vadd.xlane.f32.xlu1 %v314_v50  ;;  %991 = vmin.xlane.f32.xlu0 %v990_v49 }
 0x3ec   : > { %480 = vmin.xlane.f32.xlu1 %v479_v8  ;;  %312 = vadd.xlane.f32.xlu0 %v311_v1  ;;  %v944_v8 = vsel %vm936_vm10, %v2039_v42, 0.0 }
 0x3f0   : > { %486 = vmin.xlane.f32.xlu1 %v485_v46  ;;  %477 = vmin.xlane.f32.xlu0 %v476_v7 }
 0x3f4   : > { %492 = vmin.xlane.f32.xlu1 %v491_v61  ;;  %483 = vmin.xlane.f32.xlu0 %v482_v0 }
 0x3f8   : > { %498 = vmin.xlane.f32.xlu1 %v497_v9  ;;  %489 = vmin.xlane.f32.xlu0 %v488_v10 }
 0x3fc   : > { %495 = vmin.xlane.f32.xlu0 %v494_v13 }
 0x45d   : > { %v971_v26 = vpop.xlane.xlu0 %970 }
 0x45e   : > { %vm993_vm2 = vcmp.lt.f32.partialorder %v971_v26, inf }
 0x45f   : > { %v1001_v59 = vsel %vm993_vm2, %v971_v26, 0.0 }
 0x460   : > { %v1009_v30 = vadd.f32 %v1001_v59, %v1995_v43 }
 0x461   : > { %v974_v32 = vpop.xlane.xlu1 %973  ;;  %v977_v33 = vpop.xlane.xlu0 %976 }
 0x462   : > { %v1017_v35 = vmul.f32 0.2, %v1009_v30  ;;  %vm994_vm3 = vcmp.lt.f32.partialorder %v974_v32, inf  ;;  %vm995_vm11 = vcmp.lt.f32.partialorder %v977_v33, inf }
 0x463   : > { %v1002_v37 = vsel %vm994_vm3, %v974_v32, 0.0  ;;  %v1003_v47 = vsel %vm995_vm11, %v977_v33, 0.0 }
 0x464   : > { %v1025_v22 = vadd.f32 %v1017_v35, %v2091_v17  ;;  %v1010_v53 = vadd.f32 %v1002_v37, %v2003_v58  ;;  %v1011_v55 = vadd.f32 %v1003_v47, %v2006_v2 }
 0x465   : > { %v980_v56 = vpop.xlane.xlu1 %979 }
 0x466   : > { %1035 = vst.msk [vmem:[#allocation3] sm:$0xff] %vm1034_vm12, %v1025_v22  ;;  %v1018_v60 = vmul.f32 0.2, %v1010_v53  ;;  %v1019_v63 = vmul.f32 0.2, %v1011_v55  ;;  %vm996_vm13 = vcmp.lt.f32.partialorder %v980_v56, inf }
 0x467   : > { %v1004_v43 = vsel %vm996_vm13, %v980_v56, 0.0 }
 0x468   : > { %v1026_v21 = vadd.f32 %v1018_v60, %v2089_v19  ;;  %v1027_v29 = vadd.f32 %v1019_v63, %v2093_v24  ;;  %v1012_v11 = vadd.f32 %v1004_v43, %v2015_v62 }
 0x469   : > { %v2106_v58 = vpop.xlane.xlu1 %303  ;;  %v986_v2 = vpop.xlane.xlu0 %985 }
 0x46a   : > { %1036 = vst.msk [vmem:[#allocation3 + $0x8] sm:$0xff] %vm1034_vm12, %v1026_v21  ;;  %1037 = vst.msk [vmem:[#allocation3 + $0x10] sm:$0xff] %vm1034_vm12, %v1027_v29  ;;  %v1020_v15 = vmul.f32 0.2, %v1012_v11  ;;  %vm998_vm4 = vcmp.lt.f32.partialorder %v986_v2, inf }
 0x46b   : > { %v1006_v62 = vsel %vm998_vm4, %v986_v2, 0.0 }
 0x46c   : > { %v1028_v27 = vadd.f32 %v1020_v15, %v2106_v58  ;;  %v1014_v23 = vadd.f32 %v1006_v62, %v2030_v25 }
 0x46d   : > { %v2118_v31 = vpop.xlane.xlu1 %306  ;;  %v983_v41 = vpop.xlane.xlu0 %982  ;;  %v2128_v50 = vld [vmem:[#allocation3] sm:$0xff] }
 0x46e   : > { %1038 = vst.msk [vmem:[#allocation3 + $0x18] sm:$0xff] %vm1034_vm12, %v1028_v27  ;;  %vm997_vm9 = vcmp.lt.f32.partialorder %v983_v41, inf  ;;  %v1022_v25 = vmul.f32 0.2, %v1014_v23  ;;  %v1056_v7 = vsel %vm1034_vm12, %v2128_v50, 0.0 }
 0x46f   : > { %v1005_v28 = vsel %vm997_vm9, %v983_v41, 0.0 }
 0x470   : > { %v1013_v34 = vadd.f32 %v1005_v28, %v2018_v3  ;;  %v888_v3 = vadd.f32 %v880_v38, %v824_v44 }
 0x471   : > { %v310_v6 = vpop.xlane.xlu1 %309  ;;  %v989_v45 = vpop.xlane.xlu0 %988  ;;  %v2130_v20 = vld [vmem:[#allocation3 + $0x8] sm:$0xff]  ;;  %v2139_v9 = vld [vmem:[#allocation3 + $0x10] sm:$0xff] }
 0x472   : > { %v1021_v52 = vmul.f32 0.2, %v1013_v34  ;;  %v1030_v49 = vadd.f32 %v1022_v25, %v310_v6  ;;  %vm999_vm2 = vcmp.lt.f32.partialorder %v989_v45, inf  ;;  %v1057_v54 = vsel %vm1034_vm12, %v2130_v20, 0.0 }
 0x473   : > { %v1007_v1 = vsel %vm999_vm2, %v989_v45, 0.0  ;;  %v1058_v10 = vadd.f32 %v1057_v54, %v1056_v7  ;;  %v952_v13 = vadd.f32 %v944_v8, %v888_v3  ;;  %v1059_v30 = vsel %vm1034_vm12, %v2139_v9, 0.0 }
 0x474   : > { %v1029_v46 = vadd.f32 %v1021_v52, %v2118_v31  ;;  %1040 = vst.msk [vmem:[#allocation3 + $0x28] sm:$0xff] %vm1034_vm12, %v1030_v49  ;;  %v1015_v40 = vadd.f32 %v1007_v1, %v951_v51 }
 0x475   : > { %v316_v61 = vpop.xlane.xlu1 %315  ;;  %v992_v0 = vpop.xlane.xlu0 %991  ;;  %v2142_v18 = vld [vmem:[#allocation3 + $0x18] sm:$0xff]  ;;  %v1060_v35 = vadd.f32 %v1059_v30, %v1058_v10 }
 0x476   : > { %1039 = vst.msk [vmem:[#allocation3 + $0x20] sm:$0xff] %vm1034_vm12, %v1029_v46  ;;  %vm1000_vm3 = vcmp.lt.f32.partialorder %v992_v0, inf  ;;  %v1023_v26 = vmul.f32 0.2, %v1015_v40  ;;  %v1061_v22 = vsel %vm1034_vm12, %v2142_v18, 0.0 }
 0x477   : > { %v1008_v42 = vsel %vm1000_vm3, %v992_v0, 0.0  ;;  %v1062_v63 = vadd.f32 %v1061_v22, %v1060_v35  ;;  %v508_v30 = vld [vmem:[#allocation2] sm:$0x1] }
 0x478   : > { %v1016_v59 = vadd.f32 %v1008_v42, %v952_v13 }
 0x479   : > { %v481_v32 = vpop.xlane.xlu1 %480  ;;  %v313_v33 = vpop.xlane.xlu0 %312 }
 0x47a   : > { %v1024_v37 = vmul.f32 0.2, %v1016_v59  ;;  %v1031_v47 = vadd.f32 %v1023_v26, %v313_v33  ;;  %v501_v2 = vadd.f32 %v481_v32, %v2089_v19 }
 0x47b   : > { %v2155_v29 = vld [vmem:[#allocation3 + $0x28] sm:$0xff] }
 0x47c   : > { %v1032_v53 = vadd.f32 %v1024_v37, %v316_v61  ;;  %1041 = vst.msk [vmem:[#allocation3 + $0x30] sm:$0xff] %vm1034_vm12, %v1031_v47  ;;  %v1065_v4 = vsel %vm1034_vm12, %v2155_v29, 0.0 }
 0x47d   : > { %v487_v55 = vpop.xlane.xlu1 %486  ;;  %v478_v56 = vpop.xlane.xlu0 %477  ;;  %v2149_v60 = vld [vmem:[#allocation3 + $0x20] sm:$0xff] }
 0x47e   : > { %1042 = vst.msk [vmem:[#allocation3 + $0x38] sm:$0xff] %vm1034_vm12, %v1032_v53  ;;  %v500_v43 = vadd.f32 %v478_v56, %v2091_v17  ;;  %v1063_v21 = vsel %vm1034_vm12, %v2149_v60, 0.0  ;;  %v503_v17 = vadd.f32 %v487_v55, %v2106_v58 }
 0x47f   : > { %v1064_v11 = vadd.f32 %v1063_v21, %v1062_v63 }
 0x480   : > { %v509_v15 = vadd.f32 %v501_v2, %v500_v43 }
 0x481   : > { %v484_v12 = vpop.xlane.xlu0 %483  ;;  %v493_v16 = vpop.xlane.xlu1 %492  ;;  %v1066_v23 = vadd.f32 %v1065_v4, %v1064_v11 }
 0x482   : > { %v502_v62 = vadd.f32 %v484_v12, %v2093_v24  ;;  %v505_v25 = vadd.f32 %v493_v16, %v310_v6 }
 0x483   : > { %v2161_v27 = vld [vmem:[#allocation3 + $0x30] sm:$0xff] }
 0x484   : > { %v510_v39 = vadd.f32 %v509_v15, %v502_v62  ;;  %v1067_v41 = vsel %vm1034_vm12, %v2161_v27, 0.0 }
 0x485   : > { %v490_v57 = vpop.xlane.xlu0 %489  ;;  %v2166_v5 = vld [vmem:[#allocation3 + $0x38] sm:$0xff]  ;;  %v1068_v19 = vadd.f32 %v1067_v41, %v1066_v23  ;;  %v499_v44 = vpop.xlane.xlu1 %498 }
 0x486   : > { %v511_v48 = vadd.f32 %v510_v39, %v503_v17  ;;  %v504_v24 = vadd.f32 %v490_v57, %v2118_v31  ;;  %v1069_v28 = vsel %vm1034_vm12, %v2166_v5, 0.0  ;;  %v507_v49 = vadd.f32 %v499_v44, %v316_v61 }
 0x487   : > { %v1070_v36 = vadd.f32 %v1069_v28, %v1068_v19 }
 0x488   : > { %v512_v34 = vadd.f32 %v511_v48, %v504_v24 }
 0x489   : > { %v496_v38 = vpop.xlane.xlu0 %495  ;;  %v1071_v58 = vrot.slane %v1070_v36, 4 }
 0x48a   : > { %v513_v51 = vadd.f32 %v512_v34, %v505_v25  ;;  %v506_v45 = vadd.f32 %v496_v38, %v313_v33 }
 0x48b   : > { %v1072_v52 = vadd.f32 %v1071_v58, %v1070_v36 }
 0x48c   : > { %v514_v54 = vadd.f32 %v513_v51, %v506_v45 }
 0x48d   : > { %v1073_v8 = vrot.slane %v1072_v52, 2 }
 0x48e   : > { %v515_v1 = vadd.f32 %v514_v54, %v507_v49 }
 0x48f   : > { %v1074_v3 = vadd.f32 %v1073_v8, %v1072_v52 }
 0x490   : > { %v516_v46 = vrot.slane %v515_v1, 4 }
 0x491   : > { %v1075_v40 = vrot.slane %v1074_v3, 1 }
 0x492   : > { %v517_v31 = vadd.f32 %v516_v46, %v515_v1 }
 0x493   : > { %v1076_v7 = vadd.f32 %v1075_v40, %v1074_v3 }
 0x494   : > { %v518_v0 = vrot.slane %v517_v31, 2 }
 0x495   : > { %v1077_v10 = vmul.f32 0.015625, %v1076_v7 }
 0x496   : > { %v519_v13 = vadd.f32 %v518_v0, %v517_v31 }
 0x497   : > { %v1078_v6 = vsub.f32 %v2128_v50, %v1077_v10  ;;  %v1079_v42 = vsub.f32 %v2130_v20, %v1077_v10  ;;  %v1080_v26 = vsub.f32 %v2139_v9, %v1077_v10  ;;  %v1081_v59 = vsub.f32 %v2142_v18, %v1077_v10 }
 0x498   : > { %v520_v61 = vrot.slane %v519_v13, 1  ;;  %v1082_v32 = vsub.f32 %v2149_v60, %v1077_v10  ;;  %v1083_v22 = vsub.f32 %v2155_v29, %v1077_v10  ;;  %v1084_v21 = vsub.f32 %v2161_v27, %v1077_v10 }
 0x499   : > { %v1086_v33 = vmul.f32 %v1078_v6, %v1078_v6  ;;  %v1087_v35 = vmul.f32 %v1079_v42, %v1079_v42  ;;  %v1088_v37 = vmul.f32 %v1080_v26, %v1080_v26  ;;  %v1089_v53 = vmul.f32 %v1081_v59, %v1081_v59 }
 0x49a   : > { %v521_v47 = vadd.f32 %v520_v61, %v519_v13  ;;  %v1090_v11 = vmul.f32 %v1082_v32, %v1082_v32  ;;  %v1085_v15 = vsub.f32 %v2166_v5, %v1077_v10  ;;  %v1091_v62 = vmul.f32 %v1083_v22, %v1083_v22 }
 0x49b   : > { %v1094_v55 = vsel %vm1034_vm12, %v1086_v33, 0.0  ;;  %v1095_v56 = vsel %vm1034_vm12, %v1087_v35, 0.0  ;;  %v1097_v2 = vsel %vm1034_vm12, %v1088_v37, 0.0  ;;  %v1099_v4 = vsel %vm1034_vm12, %v1089_v53, 0.0 }
 0x49c   : > { %v522_v63 = vadd.f32 %v521_v47, %v508_v30  ;;  %v1096_v43 = vadd.f32 %v1095_v56, %v1094_v55  ;;  %v1092_v23 = vmul.f32 %v1084_v21, %v1084_v21  ;;  %v1101_v17 = vsel %vm1034_vm12, %v1090_v11, 0.0 }
 0x49d   : > { %v1093_v41 = vmul.f32 %v1085_v15, %v1085_v15  ;;  %v1103_v57 = vsel %vm1034_vm12, %v1091_v62, 0.0 }
 0x49e   : > { %524 = vst.msk [vmem:[#allocation2] sm:$0x1] %vm282_vm1, %v522_v63  ;;  %v1098_v12 = vadd.f32 %v1097_v2, %v1096_v43  ;;  %v1105_v24 = vsel %vm1034_vm12, %v1092_v23, 0.0 }
 0x49f   : > { %v1107_v25 = vsel %vm1034_vm12, %v1093_v41, 0.0 }
 0x4a0   : > { %v1100_v16 = vadd.f32 %v1099_v4, %v1098_v12 }
 0x4a2   : > { %v1102_v39 = vadd.f32 %v1101_v17, %v1100_v16 }
 0x4a4   : > { %v1104_v19 = vadd.f32 %v1103_v57, %v1102_v39 }
 0x4a5   : > { %v1046_v48 = vld [vmem:[#allocation2] sm:$0x1] }
 0x4a6   : > { %v1047_v28 = vmul.f32 0.015625, %v1046_v48  ;;  %v1106_v36 = vadd.f32 %v1105_v24, %v1104_v19 }
 0x4a8   : > { %1173 = vperm.xlu0 %1480, %v1047_v28   ;;  %v1108_v34 = vadd.f32 %v1107_v25, %v1106_v36 }
 0x4aa   : > { %v1109_v44 = vrot.slane %v1108_v34, 4 }
 0x4ac   : > { %v1110_v38 = vadd.f32 %v1109_v44, %v1108_v34 }
 0x4ae   : > { %v1111_v58 = vrot.slane %v1110_v38, 2 }
 0x4b0   : > { %v1112_v51 = vadd.f32 %v1111_v58, %v1110_v38 }
 0x4b2   : > { %v1113_v45 = vrot.slane %v1112_v51, 1 }
 0x4b4   : > { %v1114_v52 = vadd.f32 %v1113_v45, %v1112_v51 }
 0x4b6   : > { %v1115_v49 = vmul.f32 0.015873017, %v1114_v52 }
 0x4b8   : > { %1482 = vrsqrt.f32 %v1115_v49  ;;  %vm1118_vm1 = vcmp.eq.f32.partialorder %v1115_v49, inf  ;;  %v1121_v1 = vand.u32 2147483648, %v1115_v49  ;;  %vm1120_vm11 = vcmp.eq.f32.partialorder %v1115_v49, 0.0 }
 0x4c2   : > { %v1483_v54 = vpop.eup %1482 }
 0x4c3   : > { %v1117_v8 = vmul.f32 %v1483_v54, %v1115_v49 }
 0x4c5   : > { %v1119_v3 = vsel %vm1118_vm1, %v1115_v49, %v1117_v8 }
 0x4c6   : > { %v1122_v46 = vsel %vm1120_vm11, %v1121_v1, %v1119_v3 }
 0x4c7   : > { %v1123_v40 = vmul.f32 1.05, %v1122_v46 }
 0x4c9   : > { %v1124_v31 = vadd.f32 %v1123_v40, %v1077_v10 }
 0x4cb   : > { %vm1125_vm13 = vcmp.gt.f32.partialorder %v2128_v50, %v1124_v31  ;;  %vm1126_vm14 = vcmp.gt.f32.partialorder %v2130_v20, %v1124_v31  ;;  %vm1127_vm15 = vcmp.gt.f32.partialorder %v2139_v9, %v1124_v31  ;;  %vm1128_vm0 = vcmp.gt.f32.partialorder %v2142_v18, %v1124_v31 }
 0x4cc   : > { %vm1129_vm4 = vcmp.gt.f32.partialorder %v2149_v60, %v1124_v31  ;;  %v1133_v7 = vsel %vm1125_vm13, 1.0, %v1596_v14  ;;  %v1134_v0 = vsel %vm1126_vm14, 1.0, %v1596_v14  ;;  %v1135_v13 = vsel %vm1127_vm15, 1.0, %v1596_v14 }
 0x4cd   : > { %v1136_v6 = vsel %vm1128_vm0, 1.0, %v1596_v14  ;;  %vm1130_vm5 = vcmp.gt.f32.partialorder %v2155_v29, %v1124_v31  ;;  %v1141_v10 = vmul.f32 %v1133_v7, %v2128_v50  ;;  %v1142_v42 = vmul.f32 %v1134_v0, %v2130_v20 }
 0x4ce   : > { %v1143_v26 = vmul.f32 %v1135_v13, %v2139_v9  ;;  %v1137_v59 = vsel %vm1129_vm4, 1.0, %v1596_v14  ;;  %vm1131_vm6 = vcmp.gt.f32.partialorder %v2161_v27, %v1124_v31  ;;  %v1144_v61 = vmul.f32 %v1136_v6, %v2142_v18 }
 0x4cf   : > { %v1149_v30 = vsel %vm1034_vm12, %v1141_v10, 0.0  ;;  %v1150_v32 = vsel %vm1034_vm12, %v1142_v42, 0.0  ;;  %v1138_v33 = vsel %vm1130_vm5, 1.0, %v1596_v14  ;;  %vm1132_vm7 = vcmp.gt.f32.partialorder %v2166_v5, %v1124_v31 }
 0x4d0   : > { %v1151_v35 = vadd.f32 %v1150_v32, %v1149_v30  ;;  %v1145_v50 = vmul.f32 %v1137_v59, %v2149_v60  ;;  %v1152_v20 = vsel %vm1034_vm12, %v1143_v26, 0.0  ;;  %v1139_v9 = vsel %vm1131_vm6, 1.0, %v1596_v14 }
 0x4d1   : > { %v1146_v47 = vmul.f32 %v1138_v33, %v2155_v29  ;;  %v1154_v18 = vsel %vm1034_vm12, %v1144_v61, 0.0  ;;  %v1140_v22 = vsel %vm1132_vm7, 1.0, %v1596_v14  ;;  %v1147_v55 = vmul.f32 %v1139_v9, %v2161_v27 }
 0x4d2   : > { %v1153_v37 = vadd.f32 %v1152_v20, %v1151_v35  ;;  %v1156_v56 = vsel %vm1034_vm12, %v1145_v50, 0.0  ;;  %v1148_v43 = vmul.f32 %v1140_v22, %v2166_v5  ;;  %v1176_v5 = vlaneseq }
 0x4d3   : > { %v1158_v60 = vsel %vm1034_vm12, %v1146_v47, 0.0  ;;  %v1160_v11 = vsel %vm1034_vm12, %v1147_v55, 0.0 }
 0x4d4   : > { %v1155_v53 = vadd.f32 %v1154_v18, %v1153_v37  ;;  %v1162_v2 = vsel %vm1034_vm12, %v1148_v43, 0.0  ;;  %v1177_v17 = vshrl.u32 %v1176_v5, 7 }
 0x4d6   : > { %v1157_v63 = vadd.f32 %v1156_v56, %v1155_v53  ;;  %v1178_v39 = vsub.s32 0, %v1177_v17 }
 0x4d8   : > { %v1159_v21 = vadd.f32 %v1158_v60, %v1157_v63 }
 0x4da   : > { %v1161_v29 = vadd.f32 %v1160_v11, %v1159_v21 }
 0x4dc   : > { %v1163_v12 = vadd.f32 %v1162_v2, %v1161_v29 }
 0x4de   : > { %v1164_v14 = vrot.slane %v1163_v12, 4 }
 0x4e0   : > { %v1165_v15 = vadd.f32 %v1164_v14, %v1163_v12 }
 0x4e2   : > { %v1166_v27 = vrot.slane %v1165_v15, 2 }
 0x4e4   : > { %v1167_v62 = vadd.f32 %v1166_v27, %v1165_v15 }
 0x4e6   : > { %v1168_v4 = vrot.slane %v1167_v62, 1 }
 0x4e8   : > { %v1169_v16 = vadd.f32 %v1168_v4, %v1167_v62 }
 0x4ea   : > { %v1170_v23 = vmul.f32 0.015625, %v1169_v16 }
 0x4ec   : > { %1183 = vperm.xlu1 %1481, %v1170_v23  }
 0x527   : > { %v1174_v41 = vpop.permute.xlu0 %1173 }
 0x528   : > { %v1179_v57 = vrot.slane %v1174_v41, %v1178_v39 }
 0x52a   : > { %1180 = vst [vmem:[%s242_s24] sm:$0x1] %v1179_v57 }
 0x52b   : > { %1497 = shalt.err (!%p1494_p5)
}
 0x52c   : > { %s1498_s11 = scalar_lea.hbm %s2230_s5, 16  ;;  %s1502_s14 = scalar_lea.hbm %s2313_s3, 32 }
 0x52d   : > { %p1499_p6 = scmp.ne.s32.totalorder %s2230_s5, %s1498_s11  ;;  %p1503_p10 = scmp.lt.u32.totalorder %s2230_s5, %s2313_s3 }
 0x52e   : > { %p1504_p11 = scmp.lt.u32.totalorder %s1502_s14, %s1498_s11  ;;  %p1506_p13 = scmp.lt.u32.totalorder %s1498_s11, %s2230_s5 }
 0x52f   : > { %p1500_p7 = pnand %p1499_p6, %p1665_p4 }
 0x530   : > { %p1505_p12 = por %p1504_p11, %p1503_p10 }
 0x531   : > { %p1501_p9 = pneg %p1500_p7 }
 0x532   : > { %p1507_p0 = por %p1506_p13, %p1505_p12 }
 0x534   : > { %p1508_p1 = pnand %p1507_p0, %p1501_p9 }
 0x536   : > { %1511 = shalt.err (!%p1508_p1)
}
 0x537   : > { %1418 = dma.vmem_to_hbm [thread:$0]  (%p1665_p4), %s2232_s26, 16, %s2230_s5, %s1188_s6  }
 0x538   : > { %s248_s30 = scalar_lea.vmem [#allocation6], %s2221_s21  ;;  %s2264_s10 = scalar_lea.hbm %s2314_s4, %s1367_s22 }
 0x539   : > { %s1217_s7 = sshll.u32 %s248_s30, 4  ;;  %s1192_s11 = scalar_lea.sflag [#allocation7], %s2221_s21  ;;  %s2257_s7 = int_to_ptr.vmem [resolvable:$true] %s1217_s7 }
 0x53a   : > { %s1512_s12 = scalar_lea.vmem %s2257_s7, 16  ;;  %s1599_s26 = smov [#allocation6]  }
 0x53b   : > { %p1513_p2 = scmp.ne.s32.totalorder %s2257_s7, %s1512_s12  ;;  %s1516_s5 = sshll.u32 %s1599_s26, 4  ;;  %s1517_s5 = int_to_ptr.vmem [resolvable:$false] %s1516_s5 }
 0x53c   : > { %s1518_s18 = scalar_lea.vmem %s1517_s5, 32  ;;  %p1519_p6 = scmp.lt.s32.totalorder %s2257_s7, %s1517_s5 }
 0x53d   : > { %p1514_p3 = pnand %p1513_p2, %p1665_p4  ;;  %p1520_p7 = scmp.lt.s32.totalorder %s1518_s18, %s1512_s12 }
 0x53f   : > { %p1515_p5 = pneg %p1514_p3  ;;  %p1521_p9 = por %p1520_p7, %p1519_p6 }
 0x541   : > { %p1522_p10 = pnand %p1521_p9, %p1515_p5 }
 0x56b   : > { %v1184_v19 = vpop.permute.xlu1 %1183 }
 0x56c   : > { %1186 = vst [vmem:[%s248_s30] sm:$0x1] %v1184_v19 }
 0x56d   : > { %1525 = shalt.err (!%p1522_p10)
}
 0x56e   : > { %s1526_s21 = scalar_lea.hbm %s2264_s10, 16  ;;  %s1530_s13 = scalar_lea.hbm %s2314_s4, 32 }
 0x56f   : > { %p1527_p11 = scmp.ne.s32.totalorder %s2264_s10, %s1526_s21  ;;  %p1531_p0 = scmp.lt.u32.totalorder %s2264_s10, %s2314_s4 }
 0x570   : > { %p1532_p1 = scmp.lt.u32.totalorder %s1530_s13, %s1526_s21  ;;  %p1534_p3 = scmp.lt.u32.totalorder %s1526_s21, %s2264_s10 }
 0x571   : > { %p1528_p12 = pnand %p1527_p11, %p1665_p4 }
 0x572   : > { %p1533_p2 = por %p1532_p1, %p1531_p0 }
 0x573   : > { %p1529_p13 = pneg %p1528_p12 }
 0x574   : > { %p1535_p5 = por %p1534_p3, %p1533_p2 }
 0x576   : > { %p1536_p6 = pnand %p1535_p5, %p1529_p13 }
 0x578   : > { %1539 = shalt.err (!%p1536_p6)
}
 0x579   : > { %1419 = dma.vmem_to_hbm [thread:$0]  (%p1665_p4), %s2257_s7, 16, %s2264_s10, %s1192_s11  }
 0x57a PF: > { %p1429_p7 = scmp.ge.s32.totalorder %s1594_s20, 2  ;;  %s1229_s29 = sand.u32 1, %s1574_s15  }
 0x57b   : > { %s1230_s30 = scalar_lea.sflag [#allocation5], %s1229_s29 }
 0x57c   : > { %p1423_p9 = pnand %p1429_p7, %p1672_p8 }
 0x57e   : > { %1565 = dma.done.wait (!%p1423_p9), %s1230_s30, 16  }
 0x57f   : > { %1567 = vsyncadd (!%p1423_p9), %s1230_s30, 4294967280  ;;  %s1238_s8 = scalar_lea.sflag [#allocation7], %s1229_s29 }
 0x580   : > { %1569 = dma.done.wait (!%p1423_p9), %s1238_s8, 16  }
 0x581   : > { %1571 = vsyncadd (!%p1423_p9), %s1238_s8, 4294967280  ;;  %s21_s20 = sadd.s32 1, %s1594_s20   ;;  %s2317_s15 = smov %s1578_s16 }
 0x582   : > { %p18_p10 = scmp.ge.s32.totalorder %s21_s20, 4   ;;  %s2318_s16 = smov %s1582_s17 }
 0x583   : > { %s2319_s17 = smov %s1678_s28  ;;  %s2320_s18 = smov %s1590_s19 }
 0x584   : > { %s2321_s19 = smov %s2323_s23  ;;  %20 = sbr.rel (!%p18_p10) target bundleno = 6 (0x6), region = 99 }
 0x58b   :  { %1242 = vsyncpa [#allocation5], 1 }
 0x58c   :  { %1244 = vsyncpa [#allocation5 + $0x1], 1 }
 0x58d   :  { %1245 = vsyncpa [#allocation7], 1 }
 0x58e   :  { %1247 = vsyncpa [#allocation7 + $0x1], 1 }

</bundles_post_ra>
